<compile_context>
chip_gen: v7x
topology: tpu7x:2x2x1
jax: 0.10.0
libtpu: 0.0.40
codegen_flags: <defaults>
</compile_context>

<pallas_src>
import jax
import jax.numpy as jnp
from jax.experimental import pallas as pl
from jax.experimental.pallas import tpu as pltpu


def _round_up(x, m):
    return (x + m - 1) // m * m


def _tree_summ_kernel(top_ref, msent_t_ref, tokscale_ref, mcls_ref,
                      bdaj_ref, bdajt_ref,
                      wmax_ref, bmax_ref, wtree_ref, btree_ref, rootend_ref,
                      out_ref,
                      sraw_ref, sentsm_ref, ch_ref, pa_ref, tree_ref):
    bB, L, H = top_ref.shape
    S = msent_t_ref.shape[2]
    f32 = jnp.float32
    bf16 = jnp.bfloat16
    NEG = f32(1e18)

    re = rootend_ref[...]
    root_eps = re[0:1, :] * f32(1e-8)        # (1, H)  ROOT * 1e-8 (hoisted)
    end_eps = re[1:2, :] * f32(1e-8)         # (1, H)  child END * 1e-8 (hoisted)
    mcls = mcls_ref[0]                       # (bB*S, 1)

    # ---- Stage 1: masked max-pool over tokens, per sentence, written straight into
    # VMEM scratch (never materializes the reference's (S, L, H) intermediate).
    # Additive mask: top + (mask-1)*1e18 replaces compare+select.
    # TODO(synk): switch the static bB*S python loop to fori_loop for very large S.
    for b in range(bB):
        top_b = top_ref[b].astype(f32)       # (L, H)   single f32 upcast per block
        mt_b = msent_t_ref[b]                # (L, S)   token->sentence mask (transposed)
        rows = []
        for s in range(S):
            addcol = (mt_b[:, s:s + 1] - 1.0) * NEG                  # (L, 1): 0 / -1e18
            rows.append(jnp.max(top_b + addcol, axis=0, keepdims=True))  # (1, H)
        # Zero invalid sentences BEFORE the linear (sentinel removal); the mask is
        # re-applied after the linear (PyTorch order), so the result is identical.
        blk = jnp.concatenate(rows, axis=0) * mcls[b * S:(b + 1) * S, :]   # (S, H)
        sraw_ref[b * S:(b + 1) * S, :] = blk.astype(bf16)

    # ---- Stage 2: maxpool_linear over all bB*S rows (one MXU matmul, bf16 in / f32 acc)
    sents = jnp.dot(sraw_ref[...], wmax_ref[...],
                    preferred_element_type=f32) + bmax_ref[...]            # (Ms, H) f32
    sentsm_ref[...] = (sents * mcls).astype(bf16)                          # * mask_cls

    # ---- Stage 3: children / parents via block-diagonal adjacency (full-block matmuls)
    ch = jnp.dot(bdaj_ref[0].astype(bf16), sentsm_ref[...],
                 preferred_element_type=f32) + end_eps
    ch_ref[...] = ch.astype(bf16)
    pa = jnp.dot(bdajt_ref[0].astype(bf16), sentsm_ref[...],
                 preferred_element_type=f32) + root_eps
    pa_ref[...] = pa.astype(bf16)

    # ---- Stage 4: tree_info linear as three K=H matmuls on static weight row-slices
    # (same MXU push count as the fused (Ms,3H)@(3H,H); avoids the (Ms,3H) concat).
    t = jnp.dot(sentsm_ref[...], wtree_ref[0:H, :], preferred_element_type=f32)
    t = t + jnp.dot(ch_ref[...], wtree_ref[H:2 * H, :], preferred_element_type=f32)
    t = t + jnp.dot(pa_ref[...], wtree_ref[2 * H:3 * H, :], preferred_element_type=f32)
    tree_ref[...] = jnp.tanh(t + btree_ref[...]).astype(bf16)              # (Ms, H)

    # ---- Stage 5: out[b] = top[b] * colsum(mask)[:, None] + mask^T @ tree
    # (algebraic rewrite of ((top[None]+tree[:,None]) * mask).sum(axis=sentences))
    for b in range(bB):
        contrib = jnp.dot(msent_t_ref[b].astype(bf16),
                          tree_ref[b * S:(b + 1) * S, :],
                          preferred_element_type=f32)                      # (L, H)
        out_ref[b] = top_ref[b].astype(f32) * tokscale_ref[b] + contrib


def _chip_info():
    vmem_phys = None
    try:
        info = pltpu.get_tpu_info()
        vmem_phys = int(getattr(info, "vmem_capacity_bytes", 0)) or None
    except Exception:
        vmem_phys = None
    kind = ""
    try:
        kind = jax.devices()[0].device_kind.lower()
    except Exception:
        pass
    if vmem_phys is None:
        vmem_phys = 64 * 1024 * 1024          # conservative fallback (v7x per-TC)
    older = any(t in kind for t in ("v2", "v3", "v4", "v5"))
    mxu_rows = 128 if older else 256          # v5-class 128x128 MXU, v6e/v7x 256x256
    multi_core = ("v7" in kind) or ("7x" in kind)
    return vmem_phys, mxu_rows, multi_core


def _step_vmem_bytes(bB, L_pad, S_pad, H):
    """Approximate per-step VMEM footprint (double-buffered streams + weights + scratch)."""
    Ms = bB * S_pad
    stream = (bB * L_pad * H * 2              # top (bf16)
              + bB * L_pad * H * 4            # out (f32)
              + bB * L_pad * S_pad * 4        # mask^T
              + bB * L_pad * 4                # tokscale
              + Ms * 4                        # mask_cls
              + 2 * Ms * Ms * 4)              # block-diag adjacency + transpose
    weights = (4 * H * H) * 2 + 4 * H * 4     # bf16 weights + f32 biases/embeddings
    scratch = 5 * Ms * H * 2                  # bf16 VMEM scratches
    temps = 6 * Ms * H * 4                    # f32 matmul-result temporaries
    return 2 * (stream + weights) + scratch + temps


def marginal_projective_tree_summ_forward(top_vec, mask_src, mask_src_sent,
                                          mask_cls, gt_aj_matrix, params,
                                          block_b=None):
    B, L, H = top_vec.shape
    S = mask_src_sent.shape[1]
    assert H % 128 == 0, "hidden size must be a multiple of 128 (lane width)"

    # 16-row padding keeps every bf16 sublane slice/store aligned.
    L_pad = _round_up(L, 16)
    S_pad = _round_up(S, 16)

    vmem_phys, mxu_rows, multi_core = _chip_info()
    budget = int(vmem_phys * 0.7)

    if block_b is None:
        cands = [d for d in range(1, B + 1) if B % d == 0]
        if multi_core and B >= 2:
            # keep grid length >= 2 so both v7x TensorCores get work
            cands = [d for d in cands if d <= B // 2] or [1]
        feasible = [d for d in cands
                    if _step_vmem_bytes(d, L_pad, S_pad, H) <= budget and d * S_pad <= 1024]
        if not feasible:
            feasible = [min(cands)]
        reach = [d for d in feasible if d * S_pad >= mxu_rows]
        if reach:
            aligned = [d for d in reach if (d * S_pad) % mxu_rows == 0]
            block_b = min(aligned or reach)   # smallest block that fills/aligns the MXU
        else:
            block_b = max(feasible)           # can't reach target: biggest block that fits
    assert B % block_b == 0
    bB = block_b
    G = B // bB
    Ms = bB * S_pad

    vlim = int(min(max(_step_vmem_bytes(bB, L_pad, S_pad, H) + (8 << 20), 32 << 20),
                   int(vmem_phys * 0.9)))

    # ---- wrapper-side layout prep (padding with zeros is semantics-preserving:
    # padded tokens get colsum=0 and zero mask^T rows -> output 0; padded sentences
    # have mask_cls=0 and all-zero mask/adjacency rows -> contribute nothing).
    top_p = jnp.pad(top_vec, ((0, 0), (0, L_pad - L), (0, 0))).astype(jnp.bfloat16)
    msent_p = jnp.pad(mask_src_sent.astype(jnp.float32),
                      ((0, 0), (0, S_pad - S), (0, L_pad - L)))      # (B, S_pad, L_pad)
    msent_t = jnp.transpose(msent_p, (0, 2, 1))                      # (B, L_pad, S_pad)
    tokscale = jnp.sum(msent_p, axis=1)[..., None]                   # (B, L_pad, 1)
    mcls_p = jnp.pad(mask_cls.astype(jnp.float32), ((0, 0), (0, S_pad - S)))
    mcls_flat = mcls_p.reshape(G, Ms)[..., None]                     # (G, Ms, 1)

    aj_p = jnp.pad(gt_aj_matrix.astype(jnp.float32),
                   ((0, 0), (0, S_pad - S), (0, S_pad - S)))         # (B, S_pad, S_pad)
    ajb = aj_p.reshape(G, bB, S_pad, S_pad)
    eye = jnp.eye(bB, dtype=jnp.float32)
    # block-diagonal adjacency per grid block: BD[g, b*S+i, c*S+j] = aj[g,b,i,j] * [b==c]
    bdaj = (ajb[:, :, :, None, :] * eye[None, :, None, :, None]).reshape(G, Ms, Ms)
    bdajt = jnp.swapaxes(bdaj, 1, 2)                                 # block-diag of aj^T

    # PyTorch Linear stores W as (out, in); kernel does x @ W, so transpose.
    wmax = params["maxpool_w"].T.astype(jnp.bfloat16)                # (H, H)
    bmax = params["maxpool_b"].reshape(1, H).astype(jnp.float32)
    wtree = params["tree_info_w"].T.astype(jnp.bfloat16)             # (3H, H)
    btree = params["tree_info_b"].reshape(1, H).astype(jnp.float32)
    rootend = params["root_end_emb"].astype(jnp.float32)             # (2, H): [ROOT, END]

    out = pl.pallas_call(
        _tree_summ_kernel,
        out_shape=jax.ShapeDtypeStruct((B, L_pad, H), jnp.float32),
        grid_spec=pltpu.PrefetchScalarGridSpec(
            num_scalar_prefetch=0,
            grid=(G,),
            in_specs=[
                pl.BlockSpec((bB, L_pad, H), lambda g: (g, 0, 0)),       # top_vec (bf16)
                pl.BlockSpec((bB, L_pad, S_pad), lambda g: (g, 0, 0)),   # mask^T (f32)
                pl.BlockSpec((bB, L_pad, 1), lambda g: (g, 0, 0)),       # colsum(mask)
                pl.BlockSpec((1, Ms, 1), lambda g: (g, 0, 0)),           # mask_cls (flat)
                pl.BlockSpec((1, Ms, Ms), lambda g: (g, 0, 0)),          # block-diag aj
                pl.BlockSpec((1, Ms, Ms), lambda g: (g, 0, 0)),          # block-diag aj^T
                pl.BlockSpec((H, H), lambda g: (0, 0)),                  # maxpool W (bf16)
                pl.BlockSpec((1, H), lambda g: (0, 0)),                  # maxpool b
                pl.BlockSpec((3 * H, H), lambda g: (0, 0)),              # tree_info W (bf16)
                pl.BlockSpec((1, H), lambda g: (0, 0)),                  # tree_info b
                pl.BlockSpec((2, H), lambda g: (0, 0)),                  # root/end emb
            ],
            out_specs=pl.BlockSpec((bB, L_pad, H), lambda g: (g, 0, 0)),
            scratch_shapes=[
                pltpu.VMEM((Ms, H), jnp.bfloat16),   # max-pool result rows
                pltpu.VMEM((Ms, H), jnp.bfloat16),   # sents_vec (post-linear, masked)
                pltpu.VMEM((Ms, H), jnp.bfloat16),   # children embeddings
                pltpu.VMEM((Ms, H), jnp.bfloat16),   # parents embeddings
                pltpu.VMEM((Ms, H), jnp.bfloat16),   # tree_info embeddings
            ],
        ),
        compiler_params=pltpu.CompilerParams(
            dimension_semantics=("parallel",),
            vmem_limit_bytes=vlim),
    )(top_p, msent_t, tokscale, mcls_flat, bdaj, bdajt,
      wmax, bmax, wtree, btree, rootend)

    out = out[:, :L, :]

    # run_decoder=False return path of the PyTorch forward.
    return {
        "encoder_outpus": out,
        "encoder_attention_mask": mask_src,
        "sent_probs": None,             # roots is None for planning_method='ground_truth'
        "sent_relations": gt_aj_matrix,
    }


def _reference_forward(top_vec, mask_src_sent, mask_cls, aj, params):
    """Pure-JAX f32 reference of the same forward path (for validation)."""
    sents = jnp.max(jnp.where(mask_src_sent[:, :, :, None] > 0,
                              top_vec[:, None, :, :], -1e18), axis=2)          # (B,S,H)
    sents = sents @ params["maxpool_w"].T + params["maxpool_b"]
    sents = sents * mask_cls[:, :, None]
    children = jnp.einsum("bij,bjh->bih", aj, sents) + params["root_end_emb"][1] * 1e-8
    parents = jnp.einsum("bji,bjh->bih", aj, sents) + params["root_end_emb"][0] * 1e-8
    tree = jnp.tanh(jnp.concatenate([sents, children, parents], -1)
                    @ params["tree_info_w"].T + params["tree_info_b"])         # (B,S,H)
    expanded = (top_vec[:, None, :, :] + tree[:, :, None, :]) * mask_src_sent[:, :, :, None]
    return jnp.sum(expanded, axis=1)                                           # (B,L,H)


if __name__ == "__main__":
    B, S, L, H = 2, 8, 32, 128  # batch, sentences, tokens, hidden

    key = jax.random.PRNGKey(0)
    keys = jax.random.split(key, 6)

    # Stand-in for encoder.last_hidden_state.
    top_vec = jax.random.normal(keys[0], (B, L, H), dtype=jnp.float32)
    mask_src = jnp.ones((B, L), dtype=jnp.float32)

    # Contiguous sentence segmentation: sentence s owns tokens [s*L/S, (s+1)*L/S).
    sent_of_tok = jnp.arange(L) // (L // S)
    msent_1 = (sent_of_tok[None, :] == jnp.arange(S)[:, None]).astype(jnp.float32)
    mask_src_sent = jnp.broadcast_to(msent_1[None], (B, S, L))

    mask_cls = jnp.ones((B, S), dtype=jnp.float32)

    # Row-stochastic ground-truth adjacency matrix.
    aj_raw = jax.nn.softplus(jax.random.normal(keys[1], (B, S, S), dtype=jnp.float32))
    gt_aj_matrix = aj_raw / jnp.sum(aj_raw, axis=-1, keepdims=True)

    def xavier(k, shape):  # shape = (out, in), PyTorch convention
        fan_out, fan_in = shape
        limit = (6.0 / (fan_in + fan_out)) ** 0.5
        return jax.random.uniform(k, shape, jnp.float32, -limit, limit)

    params = {
        "maxpool_w": xavier(keys[2], (H, H)),            # nn.Linear(H, H)
        "maxpool_b": jnp.zeros((H,), jnp.float32),
        "tree_info_w": xavier(keys[3], (H, 3 * H)),      # nn.Linear(3H, tree_info_dim=H)
        "tree_info_b": jnp.zeros((H,), jnp.float32),
        "root_end_emb": 0.02 * jax.random.normal(keys[4], (2, H), dtype=jnp.float32),
    }

    result = marginal_projective_tree_summ_forward(
        top_vec, mask_src, mask_src_sent, mask_cls, gt_aj_matrix, params)
    enc = jax.block_until_ready(result["encoder_outpus"])
    assert enc.shape == (B, L, H)
    assert jnp.all(jnp.isfinite(enc))

    # Validate against the f32 reference (kernel uses bf16 MXU inputs / f32 acc).
    ref = _reference_forward(top_vec, mask_src_sent, mask_cls, gt_aj_matrix, params)
    max_err = float(jnp.max(jnp.abs(enc - ref)))
    assert max_err < 0.3, f"max abs error vs f32 reference too large: {max_err}"

    print("KERNEL_OK")
</pallas_src>

<mosaic_0001>
module attributes {stable_mosaic.version = 11 : i64} {
  func.func @_tree_summ_kernel(%arg0: i32, %arg1: memref<2x32x128xbf16, #tpu.memory_space<vmem>>, %arg2: memref<2x32x16xf32, #tpu.memory_space<vmem>>, %arg3: memref<2x32x1xf32, #tpu.memory_space<vmem>>, %arg4: memref<1x32x1xf32, #tpu.memory_space<vmem>>, %arg5: memref<1x32x32xf32, #tpu.memory_space<vmem>>, %arg6: memref<1x32x32xf32, #tpu.memory_space<vmem>>, %arg7: memref<128x128xbf16, #tpu.memory_space<vmem>>, %arg8: memref<1x128xf32, #tpu.memory_space<vmem>>, %arg9: memref<384x128xbf16, #tpu.memory_space<vmem>>, %arg10: memref<1x128xf32, #tpu.memory_space<vmem>>, %arg11: memref<2x128xf32, #tpu.memory_space<vmem>>, %arg12: memref<2x32x128xf32, #tpu.memory_space<vmem>>, %arg13: memref<32x128xbf16, #tpu.memory_space<vmem>>, %arg14: memref<32x128xbf16, #tpu.memory_space<vmem>>, %arg15: memref<32x128xbf16, #tpu.memory_space<vmem>>, %arg16: memref<32x128xbf16, #tpu.memory_space<vmem>>, %arg17: memref<32x128xbf16, #tpu.memory_space<vmem>>) attributes {dimension_semantics = [#tpu.dimension_semantics<parallel>], iteration_bounds = array<i64: 1>, scalar_prefetch = 0 : i64, scratch_operands = 5 : i64, tpu.core_type = #tpu.core_type<tc>, window_params = [{transform_indices = @transform_0, window_bounds = array<i64: 2, 32, 128>}, {transform_indices = @transform_1, window_bounds = array<i64: 2, 32, 16>}, {transform_indices = @transform_2, window_bounds = array<i64: 2, 32, 1>}, {transform_indices = @transform_3, window_bounds = array<i64: 1, 32, 1>}, {transform_indices = @transform_4, window_bounds = array<i64: 1, 32, 32>}, {transform_indices = @transform_5, window_bounds = array<i64: 1, 32, 32>}, {pipeline_mode = #tpu.pipeline_mode<synchronous>, transform_indices = @transform_6, window_bounds = array<i64: 128, 128>}, {pipeline_mode = #tpu.pipeline_mode<synchronous>, transform_indices = @transform_7, window_bounds = array<i64: 1, 128>}, {pipeline_mode = #tpu.pipeline_mode<synchronous>, transform_indices = @transform_8, window_bounds = array<i64: 384, 128>}, {pipeline_mode = #tpu.pipeline_mode<synchronous>, transform_indices = @transform_9, window_bounds = array<i64: 1, 128>}, {pipeline_mode = #tpu.pipeline_mode<synchronous>, transform_indices = @transform_10, window_bounds = array<i64: 2, 128>}, {transform_indices = @transform_11, window_bounds = array<i64: 2, 32, 128>}]} {
    %c0 = arith.constant 0 : index
    %c0_0 = arith.constant 0 : index
    %0 = vector.load %arg11[%c0, %c0_0] : memref<2x128xf32, #tpu.memory_space<vmem>>, vector<2x128xf32>
    %1 = vector.extract_strided_slice %0 {offsets = [0, 0], sizes = [1, 128], strides = [1, 1]} : vector<2x128xf32> to vector<1x128xf32>
    %cst = arith.constant 9.99999993E-9 : f32
    %2 = vector.broadcast %cst : f32 to vector<1x128xf32>
    %3 = arith.mulf %1, %2 : vector<1x128xf32>
    %4 = vector.extract_strided_slice %0 {offsets = [1, 0], sizes = [1, 128], strides = [1, 1]} : vector<2x128xf32> to vector<1x128xf32>
    %cst_1 = arith.constant 9.99999993E-9 : f32
    %5 = vector.broadcast %cst_1 : f32 to vector<1x128xf32>
    %6 = arith.mulf %4, %5 : vector<1x128xf32>
    %c0_2 = arith.constant 0 : index
    %c0_3 = arith.constant 0 : index
    %c0_4 = arith.constant 0 : index
    %7 = vector.load %arg4[%c0_2, %c0_3, %c0_4] : memref<1x32x1xf32, #tpu.memory_space<vmem>>, vector<1x32x1xf32>
    %8 = vector.shape_cast %7 : vector<1x32x1xf32> to vector<32x1xf32>
    %c0_5 = arith.constant 0 : index
    %c0_6 = arith.constant 0 : index
    %c0_7 = arith.constant 0 : index
    %9 = vector.load %arg1[%c0_5, %c0_6, %c0_7] : memref<2x32x128xbf16, #tpu.memory_space<vmem>>, vector<1x32x128xbf16>
    %10 = vector.shape_cast %9 : vector<1x32x128xbf16> to vector<32x128xbf16>
    %11 = arith.extf %10 : vector<32x128xbf16> to vector<32x128xf32>
    %c0_8 = arith.constant 0 : index
    %c0_9 = arith.constant 0 : index
    %c0_10 = arith.constant 0 : index
    %12 = vector.load %arg2[%c0_8, %c0_9, %c0_10] : memref<2x32x16xf32, #tpu.memory_space<vmem>>, vector<1x32x16xf32>
    %13 = vector.shape_cast %12 : vector<1x32x16xf32> to vector<32x16xf32>
    %14 = vector.extract_strided_slice %13 {offsets = [0, 0], sizes = [32, 1], strides = [1, 1]} : vector<32x16xf32> to vector<32x1xf32>
    %cst_11 = arith.constant 1.000000e+00 : f32
    %15 = vector.broadcast %cst_11 : f32 to vector<32x1xf32>
    %16 = arith.subf %14, %15 : vector<32x1xf32>
    %cst_12 = arith.constant 9.99999984E+17 : f32
    %17 = vector.broadcast %cst_12 : f32 to vector<32x1xf32>
    %18 = arith.mulf %16, %17 : vector<32x1xf32>
    %19 = vector.broadcast %18 : vector<32x1xf32> to vector<32x128xf32>
    %20 = arith.addf %11, %19 : vector<32x128xf32>
    %cst_13 = arith.constant dense<0xFF800000> : vector<128xf32>
    %21 = vector.multi_reduction <maximumf>, %20, %cst_13 [0] : vector<32x128xf32> to vector<128xf32>
    %22 = vector.shape_cast %21 : vector<128xf32> to vector<1x128xf32>
    %23 = vector.extract_strided_slice %13 {offsets = [0, 1], sizes = [32, 1], strides = [1, 1]} : vector<32x16xf32> to vector<32x1xf32>
    %cst_14 = arith.constant 1.000000e+00 : f32
    %24 = vector.broadcast %cst_14 : f32 to vector<32x1xf32>
    %25 = arith.subf %23, %24 : vector<32x1xf32>
    %cst_15 = arith.constant 9.99999984E+17 : f32
    %26 = vector.broadcast %cst_15 : f32 to vector<32x1xf32>
    %27 = arith.mulf %25, %26 : vector<32x1xf32>
    %28 = vector.broadcast %27 : vector<32x1xf32> to vector<32x128xf32>
    %29 = arith.addf %11, %28 : vector<32x128xf32>
    %cst_16 = arith.constant dense<0xFF800000> : vector<128xf32>
    %30 = vector.multi_reduction <maximumf>, %29, %cst_16 [0] : vector<32x128xf32> to vector<128xf32>
    %31 = vector.shape_cast %30 : vector<128xf32> to vector<1x128xf32>
    %32 = vector.extract_strided_slice %13 {offsets = [0, 2], sizes = [32, 1], strides = [1, 1]} : vector<32x16xf32> to vector<32x1xf32>
    %cst_17 = arith.constant 1.000000e+00 : f32
    %33 = vector.broadcast %cst_17 : f32 to vector<32x1xf32>
    %34 = arith.subf %32, %33 : vector<32x1xf32>
    %cst_18 = arith.constant 9.99999984E+17 : f32
    %35 = vector.broadcast %cst_18 : f32 to vector<32x1xf32>
    %36 = arith.mulf %34, %35 : vector<32x1xf32>
    %37 = vector.broadcast %36 : vector<32x1xf32> to vector<32x128xf32>
    %38 = arith.addf %11, %37 : vector<32x128xf32>
    %cst_19 = arith.constant dense<0xFF800000> : vector<128xf32>
    %39 = vector.multi_reduction <maximumf>, %38, %cst_19 [0] : vector<32x128xf32> to vector<128xf32>
    %40 = vector.shape_cast %39 : vector<128xf32> to vector<1x128xf32>
    %41 = vector.extract_strided_slice %13 {offsets = [0, 3], sizes = [32, 1], strides = [1, 1]} : vector<32x16xf32> to vector<32x1xf32>
    %cst_20 = arith.constant 1.000000e+00 : f32
    %42 = vector.broadcast %cst_20 : f32 to vector<32x1xf32>
    %43 = arith.subf %41, %42 : vector<32x1xf32>
    %cst_21 = arith.constant 9.99999984E+17 : f32
    %44 = vector.broadcast %cst_21 : f32 to vector<32x1xf32>
    %45 = arith.mulf %43, %44 : vector<32x1xf32>
    %46 = vector.broadcast %45 : vector<32x1xf32> to vector<32x128xf32>
    %47 = arith.addf %11, %46 : vector<32x128xf32>
    %cst_22 = arith.constant dense<0xFF800000> : vector<128xf32>
    %48 = vector.multi_reduction <maximumf>, %47, %cst_22 [0] : vector<32x128xf32> to vector<128xf32>
    %49 = vector.shape_cast %48 : vector<128xf32> to vector<1x128xf32>
    %50 = vector.extract_strided_slice %13 {offsets = [0, 4], sizes = [32, 1], strides = [1, 1]} : vector<32x16xf32> to vector<32x1xf32>
    %cst_23 = arith.constant 1.000000e+00 : f32
    %51 = vector.broadcast %cst_23 : f32 to vector<32x1xf32>
    %52 = arith.subf %50, %51 : vector<32x1xf32>
    %cst_24 = arith.constant 9.99999984E+17 : f32
    %53 = vector.broadcast %cst_24 : f32 to vector<32x1xf32>
    %54 = arith.mulf %52, %53 : vector<32x1xf32>
    %55 = vector.broadcast %54 : vector<32x1xf32> to vector<32x128xf32>
    %56 = arith.addf %11, %55 : vector<32x128xf32>
    %cst_25 = arith.constant dense<0xFF800000> : vector<128xf32>
    %57 = vector.multi_reduction <maximumf>, %56, %cst_25 [0] : vector<32x128xf32> to vector<128xf32>
    %58 = vector.shape_cast %57 : vector<128xf32> to vector<1x128xf32>
    %59 = vector.extract_strided_slice %13 {offsets = [0, 5], sizes = [32, 1], strides = [1, 1]} : vector<32x16xf32> to vector<32x1xf32>
    %cst_26 = arith.constant 1.000000e+00 : f32
    %60 = vector.broadcast %cst_26 : f32 to vector<32x1xf32>
    %61 = arith.subf %59, %60 : vector<32x1xf32>
    %cst_27 = arith.constant 9.99999984E+17 : f32
    %62 = vector.broadcast %cst_27 : f32 to vector<32x1xf32>
    %63 = arith.mulf %61, %62 : vector<32x1xf32>
    %64 = vector.broadcast %63 : vector<32x1xf32> to vector<32x128xf32>
    %65 = arith.addf %11, %64 : vector<32x128xf32>
    %cst_28 = arith.constant dense<0xFF800000> : vector<128xf32>
    %66 = vector.multi_reduction <maximumf>, %65, %cst_28 [0] : vector<32x128xf32> to vector<128xf32>
    %67 = vector.shape_cast %66 : vector<128xf32> to vector<1x128xf32>
    %68 = vector.extract_strided_slice %13 {offsets = [0, 6], sizes = [32, 1], strides = [1, 1]} : vector<32x16xf32> to vector<32x1xf32>
    %cst_29 = arith.constant 1.000000e+00 : f32
    %69 = vector.broadcast %cst_29 : f32 to vector<32x1xf32>
    %70 = arith.subf %68, %69 : vector<32x1xf32>
    %cst_30 = arith.constant 9.99999984E+17 : f32
    %71 = vector.broadcast %cst_30 : f32 to vector<32x1xf32>
    %72 = arith.mulf %70, %71 : vector<32x1xf32>
    %73 = vector.broadcast %72 : vector<32x1xf32> to vector<32x128xf32>
    %74 = arith.addf %11, %73 : vector<32x128xf32>
    %cst_31 = arith.constant dense<0xFF800000> : vector<128xf32>
    %75 = vector.multi_reduction <maximumf>, %74, %cst_31 [0] : vector<32x128xf32> to vector<128xf32>
    %76 = vector.shape_cast %75 : vector<128xf32> to vector<1x128xf32>
    %77 = vector.extract_strided_slice %13 {offsets = [0, 7], sizes = [32, 1], strides = [1, 1]} : vector<32x16xf32> to vector<32x1xf32>
    %cst_32 = arith.constant 1.000000e+00 : f32
    %78 = vector.broadcast %cst_32 : f32 to vector<32x1xf32>
    %79 = arith.subf %77, %78 : vector<32x1xf32>
    %cst_33 = arith.constant 9.99999984E+17 : f32
    %80 = vector.broadcast %cst_33 : f32 to vector<32x1xf32>
    %81 = arith.mulf %79, %80 : vector<32x1xf32>
    %82 = vector.broadcast %81 : vector<32x1xf32> to vector<32x128xf32>
    %83 = arith.addf %11, %82 : vector<32x128xf32>
    %cst_34 = arith.constant dense<0xFF800000> : vector<128xf32>
    %84 = vector.multi_reduction <maximumf>, %83, %cst_34 [0] : vector<32x128xf32> to vector<128xf32>
    %85 = vector.shape_cast %84 : vector<128xf32> to vector<1x128xf32>
    %86 = vector.extract_strided_slice %13 {offsets = [0, 8], sizes = [32, 1], strides = [1, 1]} : vector<32x16xf32> to vector<32x1xf32>
    %cst_35 = arith.constant 1.000000e+00 : f32
    %87 = vector.broadcast %cst_35 : f32 to vector<32x1xf32>
    %88 = arith.subf %86, %87 : vector<32x1xf32>
    %cst_36 = arith.constant 9.99999984E+17 : f32
    %89 = vector.broadcast %cst_36 : f32 to vector<32x1xf32>
    %90 = arith.mulf %88, %89 : vector<32x1xf32>
    %91 = vector.broadcast %90 : vector<32x1xf32> to vector<32x128xf32>
    %92 = arith.addf %11, %91 : vector<32x128xf32>
    %cst_37 = arith.constant dense<0xFF800000> : vector<128xf32>
    %93 = vector.multi_reduction <maximumf>, %92, %cst_37 [0] : vector<32x128xf32> to vector<128xf32>
    %94 = vector.shape_cast %93 : vector<128xf32> to vector<1x128xf32>
    %95 = vector.extract_strided_slice %13 {offsets = [0, 9], sizes = [32, 1], strides = [1, 1]} : vector<32x16xf32> to vector<32x1xf32>
    %cst_38 = arith.constant 1.000000e+00 : f32
    %96 = vector.broadcast %cst_38 : f32 to vector<32x1xf32>
    %97 = arith.subf %95, %96 : vector<32x1xf32>
    %cst_39 = arith.constant 9.99999984E+17 : f32
    %98 = vector.broadcast %cst_39 : f32 to vector<32x1xf32>
    %99 = arith.mulf %97, %98 : vector<32x1xf32>
    %100 = vector.broadcast %99 : vector<32x1xf32> to vector<32x128xf32>
    %101 = arith.addf %11, %100 : vector<32x128xf32>
    %cst_40 = arith.constant dense<0xFF800000> : vector<128xf32>
    %102 = vector.multi_reduction <maximumf>, %101, %cst_40 [0] : vector<32x128xf32> to vector<128xf32>
    %103 = vector.shape_cast %102 : vector<128xf32> to vector<1x128xf32>
    %104 = vector.extract_strided_slice %13 {offsets = [0, 10], sizes = [32, 1], strides = [1, 1]} : vector<32x16xf32> to vector<32x1xf32>
    %cst_41 = arith.constant 1.000000e+00 : f32
    %105 = vector.broadcast %cst_41 : f32 to vector<32x1xf32>
    %106 = arith.subf %104, %105 : vector<32x1xf32>
    %cst_42 = arith.constant 9.99999984E+17 : f32
    %107 = vector.broadcast %cst_42 : f32 to vector<32x1xf32>
    %108 = arith.mulf %106, %107 : vector<32x1xf32>
    %109 = vector.broadcast %108 : vector<32x1xf32> to vector<32x128xf32>
    %110 = arith.addf %11, %109 : vector<32x128xf32>
    %cst_43 = arith.constant dense<0xFF800000> : vector<128xf32>
    %111 = vector.multi_reduction <maximumf>, %110, %cst_43 [0] : vector<32x128xf32> to vector<128xf32>
    %112 = vector.shape_cast %111 : vector<128xf32> to vector<1x128xf32>
    %113 = vector.extract_strided_slice %13 {offsets = [0, 11], sizes = [32, 1], strides = [1, 1]} : vector<32x16xf32> to vector<32x1xf32>
    %cst_44 = arith.constant 1.000000e+00 : f32
    %114 = vector.broadcast %cst_44 : f32 to vector<32x1xf32>
    %115 = arith.subf %113, %114 : vector<32x1xf32>
    %cst_45 = arith.constant 9.99999984E+17 : f32
    %116 = vector.broadcast %cst_45 : f32 to vector<32x1xf32>
    %117 = arith.mulf %115, %116 : vector<32x1xf32>
    %118 = vector.broadcast %117 : vector<32x1xf32> to vector<32x128xf32>
    %119 = arith.addf %11, %118 : vector<32x128xf32>
    %cst_46 = arith.constant dense<0xFF800000> : vector<128xf32>
    %120 = vector.multi_reduction <maximumf>, %119, %cst_46 [0] : vector<32x128xf32> to vector<128xf32>
    %121 = vector.shape_cast %120 : vector<128xf32> to vector<1x128xf32>
    %122 = vector.extract_strided_slice %13 {offsets = [0, 12], sizes = [32, 1], strides = [1, 1]} : vector<32x16xf32> to vector<32x1xf32>
    %cst_47 = arith.constant 1.000000e+00 : f32
    %123 = vector.broadcast %cst_47 : f32 to vector<32x1xf32>
    %124 = arith.subf %122, %123 : vector<32x1xf32>
    %cst_48 = arith.constant 9.99999984E+17 : f32
    %125 = vector.broadcast %cst_48 : f32 to vector<32x1xf32>
    %126 = arith.mulf %124, %125 : vector<32x1xf32>
    %127 = vector.broadcast %126 : vector<32x1xf32> to vector<32x128xf32>
    %128 = arith.addf %11, %127 : vector<32x128xf32>
    %cst_49 = arith.constant dense<0xFF800000> : vector<128xf32>
    %129 = vector.multi_reduction <maximumf>, %128, %cst_49 [0] : vector<32x128xf32> to vector<128xf32>
    %130 = vector.shape_cast %129 : vector<128xf32> to vector<1x128xf32>
    %131 = vector.extract_strided_slice %13 {offsets = [0, 13], sizes = [32, 1], strides = [1, 1]} : vector<32x16xf32> to vector<32x1xf32>
    %cst_50 = arith.constant 1.000000e+00 : f32
    %132 = vector.broadcast %cst_50 : f32 to vector<32x1xf32>
    %133 = arith.subf %131, %132 : vector<32x1xf32>
    %cst_51 = arith.constant 9.99999984E+17 : f32
    %134 = vector.broadcast %cst_51 : f32 to vector<32x1xf32>
    %135 = arith.mulf %133, %134 : vector<32x1xf32>
    %136 = vector.broadcast %135 : vector<32x1xf32> to vector<32x128xf32>
    %137 = arith.addf %11, %136 : vector<32x128xf32>
    %cst_52 = arith.constant dense<0xFF800000> : vector<128xf32>
    %138 = vector.multi_reduction <maximumf>, %137, %cst_52 [0] : vector<32x128xf32> to vector<128xf32>
    %139 = vector.shape_cast %138 : vector<128xf32> to vector<1x128xf32>
    %140 = vector.extract_strided_slice %13 {offsets = [0, 14], sizes = [32, 1], strides = [1, 1]} : vector<32x16xf32> to vector<32x1xf32>
    %cst_53 = arith.constant 1.000000e+00 : f32
    %141 = vector.broadcast %cst_53 : f32 to vector<32x1xf32>
    %142 = arith.subf %140, %141 : vector<32x1xf32>
    %cst_54 = arith.constant 9.99999984E+17 : f32
    %143 = vector.broadcast %cst_54 : f32 to vector<32x1xf32>
    %144 = arith.mulf %142, %143 : vector<32x1xf32>
    %145 = vector.broadcast %144 : vector<32x1xf32> to vector<32x128xf32>
    %146 = arith.addf %11, %145 : vector<32x128xf32>
    %cst_55 = arith.constant dense<0xFF800000> : vector<128xf32>
    %147 = vector.multi_reduction <maximumf>, %146, %cst_55 [0] : vector<32x128xf32> to vector<128xf32>
    %148 = vector.shape_cast %147 : vector<128xf32> to vector<1x128xf32>
    %149 = vector.extract_strided_slice %13 {offsets = [0, 15], sizes = [32, 1], strides = [1, 1]} : vector<32x16xf32> to vector<32x1xf32>
    %cst_56 = arith.constant 1.000000e+00 : f32
    %150 = vector.broadcast %cst_56 : f32 to vector<32x1xf32>
    %151 = arith.subf %149, %150 : vector<32x1xf32>
    %cst_57 = arith.constant 9.99999984E+17 : f32
    %152 = vector.broadcast %cst_57 : f32 to vector<32x1xf32>
    %153 = arith.mulf %151, %152 : vector<32x1xf32>
    %154 = vector.broadcast %153 : vector<32x1xf32> to vector<32x128xf32>
    %155 = arith.addf %11, %154 : vector<32x128xf32>
    %cst_58 = arith.constant dense<0xFF800000> : vector<128xf32>
    %156 = vector.multi_reduction <maximumf>, %155, %cst_58 [0] : vector<32x128xf32> to vector<128xf32>
    %157 = vector.shape_cast %156 : vector<128xf32> to vector<1x128xf32>
    %158 = tpu.concatenate %22, %31, %40, %49, %58, %67, %76, %85, %94, %103, %112, %121, %130, %139, %148, %157 in 0 : vector<1x128xf32>, vector<1x128xf32>, vector<1x128xf32>, vector<1x128xf32>, vector<1x128xf32>, vector<1x128xf32>, vector<1x128xf32>, vector<1x128xf32>, vector<1x128xf32>, vector<1x128xf32>, vector<1x128xf32>, vector<1x128xf32>, vector<1x128xf32>, vector<1x128xf32>, vector<1x128xf32>, vector<1x128xf32> -> vector<16x128xf32>
    %159 = vector.extract_strided_slice %8 {offsets = [0, 0], sizes = [16, 1], strides = [1, 1]} : vector<32x1xf32> to vector<16x1xf32>
    %160 = vector.broadcast %159 : vector<16x1xf32> to vector<16x128xf32>
    %161 = arith.mulf %158, %160 : vector<16x128xf32>
    %162 = arith.truncf %161 : vector<16x128xf32> to vector<16x128xbf16>
    %c0_59 = arith.constant 0 : index
    %c0_60 = arith.constant 0 : index
    %163 = vector.load %arg13[%c0_59, %c0_60] : memref<32x128xbf16, #tpu.memory_space<vmem>>, vector<16x128xbf16>
    tpu.vector_store %arg13[%c0_59, %c0_60], %162 {strides = array<i32>} : memref<32x128xbf16, #tpu.memory_space<vmem>>, vector<16x128xbf16>,
    %c1 = arith.constant 1 : index
    %c0_61 = arith.constant 0 : index
    %c0_62 = arith.constant 0 : index
    %164 = vector.load %arg1[%c1, %c0_61, %c0_62] : memref<2x32x128xbf16, #tpu.memory_space<vmem>>, vector<1x32x128xbf16>
    %165 = vector.shape_cast %164 : vector<1x32x128xbf16> to vector<32x128xbf16>
    %166 = arith.extf %165 : vector<32x128xbf16> to vector<32x128xf32>
    %c1_63 = arith.constant 1 : index
    %c0_64 = arith.constant 0 : index
    %c0_65 = arith.constant 0 : index
    %167 = vector.load %arg2[%c1_63, %c0_64, %c0_65] : memref<2x32x16xf32, #tpu.memory_space<vmem>>, vector<1x32x16xf32>
    %168 = vector.shape_cast %167 : vector<1x32x16xf32> to vector<32x16xf32>
    %169 = vector.extract_strided_slice %168 {offsets = [0, 0], sizes = [32, 1], strides = [1, 1]} : vector<32x16xf32> to vector<32x1xf32>
    %cst_66 = arith.constant 1.000000e+00 : f32
    %170 = vector.broadcast %cst_66 : f32 to vector<32x1xf32>
    %171 = arith.subf %169, %170 : vector<32x1xf32>
    %cst_67 = arith.constant 9.99999984E+17 : f32
    %172 = vector.broadcast %cst_67 : f32 to vector<32x1xf32>
    %173 = arith.mulf %171, %172 : vector<32x1xf32>
    %174 = vector.broadcast %173 : vector<32x1xf32> to vector<32x128xf32>
    %175 = arith.addf %166, %174 : vector<32x128xf32>
    %cst_68 = arith.constant dense<0xFF800000> : vector<128xf32>
    %176 = vector.multi_reduction <maximumf>, %175, %cst_68 [0] : vector<32x128xf32> to vector<128xf32>
    %177 = vector.shape_cast %176 : vector<128xf32> to vector<1x128xf32>
    %178 = vector.extract_strided_slice %168 {offsets = [0, 1], sizes = [32, 1], strides = [1, 1]} : vector<32x16xf32> to vector<32x1xf32>
    %cst_69 = arith.constant 1.000000e+00 : f32
    %179 = vector.broadcast %cst_69 : f32 to vector<32x1xf32>
    %180 = arith.subf %178, %179 : vector<32x1xf32>
    %cst_70 = arith.constant 9.99999984E+17 : f32
    %181 = vector.broadcast %cst_70 : f32 to vector<32x1xf32>
    %182 = arith.mulf %180, %181 : vector<32x1xf32>
    %183 = vector.broadcast %182 : vector<32x1xf32> to vector<32x128xf32>
    %184 = arith.addf %166, %183 : vector<32x128xf32>
    %cst_71 = arith.constant dense<0xFF800000> : vector<128xf32>
    %185 = vector.multi_reduction <maximumf>, %184, %cst_71 [0] : vector<32x128xf32> to vector<128xf32>
    %186 = vector.shape_cast %185 : vector<128xf32> to vector<1x128xf32>
    %187 = vector.extract_strided_slice %168 {offsets = [0, 2], sizes = [32, 1], strides = [1, 1]} : vector<32x16xf32> to vector<32x1xf32>
    %cst_72 = arith.constant 1.000000e+00 : f32
    %188 = vector.broadcast %cst_72 : f32 to vector<32x1xf32>
    %189 = arith.subf %187, %188 : vector<32x1xf32>
    %cst_73 = arith.constant 9.99999984E+17 : f32
    %190 = vector.broadcast %cst_73 : f32 to vector<32x1xf32>
    %191 = arith.mulf %189, %190 : vector<32x1xf32>
    %192 = vector.broadcast %191 : vector<32x1xf32> to vector<32x128xf32>
    %193 = arith.addf %166, %192 : vector<32x128xf32>
    %cst_74 = arith.constant dense<0xFF800000> : vector<128xf32>
    %194 = vector.multi_reduction <maximumf>, %193, %cst_74 [0] : vector<32x128xf32> to vector<128xf32>
    %195 = vector.shape_cast %194 : vector<128xf32> to vector<1x128xf32>
    %196 = vector.extract_strided_slice %168 {offsets = [0, 3], sizes = [32, 1], strides = [1, 1]} : vector<32x16xf32> to vector<32x1xf32>
    %cst_75 = arith.constant 1.000000e+00 : f32
    %197 = vector.broadcast %cst_75 : f32 to vector<32x1xf32>
    %198 = arith.subf %196, %197 : vector<32x1xf32>
    %cst_76 = arith.constant 9.99999984E+17 : f32
    %199 = vector.broadcast %cst_76 : f32 to vector<32x1xf32>
    %200 = arith.mulf %198, %199 : vector<32x1xf32>
    %201 = vector.broadcast %200 : vector<32x1xf32> to vector<32x128xf32>
    %202 = arith.addf %166, %201 : vector<32x128xf32>
    %cst_77 = arith.constant dense<0xFF800000> : vector<128xf32>
    %203 = vector.multi_reduction <maximumf>, %202, %cst_77 [0] : vector<32x128xf32> to vector<128xf32>
    %204 = vector.shape_cast %203 : vector<128xf32> to vector<1x128xf32>
    %205 = vector.extract_strided_slice %168 {offsets = [0, 4], sizes = [32, 1], strides = [1, 1]} : vector<32x16xf32> to vector<32x1xf32>
    %cst_78 = arith.constant 1.000000e+00 : f32
    %206 = vector.broadcast %cst_78 : f32 to vector<32x1xf32>
    %207 = arith.subf %205, %206 : vector<32x1xf32>
    %cst_79 = arith.constant 9.99999984E+17 : f32
    %208 = vector.broadcast %cst_79 : f32 to vector<32x1xf32>
    %209 = arith.mulf %207, %208 : vector<32x1xf32>
    %210 = vector.broadcast %209 : vector<32x1xf32> to vector<32x128xf32>
    %211 = arith.addf %166, %210 : vector<32x128xf32>
    %cst_80 = arith.constant dense<0xFF800000> : vector<128xf32>
    %212 = vector.multi_reduction <maximumf>, %211, %cst_80 [0] : vector<32x128xf32> to vector<128xf32>
    %213 = vector.shape_cast %212 : vector<128xf32> to vector<1x128xf32>
    %214 = vector.extract_strided_slice %168 {offsets = [0, 5], sizes = [32, 1], strides = [1, 1]} : vector<32x16xf32> to vector<32x1xf32>
    %cst_81 = arith.constant 1.000000e+00 : f32
    %215 = vector.broadcast %cst_81 : f32 to vector<32x1xf32>
    %216 = arith.subf %214, %215 : vector<32x1xf32>
    %cst_82 = arith.constant 9.99999984E+17 : f32
    %217 = vector.broadcast %cst_82 : f32 to vector<32x1xf32>
    %218 = arith.mulf %216, %217 : vector<32x1xf32>
    %219 = vector.broadcast %218 : vector<32x1xf32> to vector<32x128xf32>
    %220 = arith.addf %166, %219 : vector<32x128xf32>
    %cst_83 = arith.constant dense<0xFF800000> : vector<128xf32>
    %221 = vector.multi_reduction <maximumf>, %220, %cst_83 [0] : vector<32x128xf32> to vector<128xf32>
    %222 = vector.shape_cast %221 : vector<128xf32> to vector<1x128xf32>
    %223 = vector.extract_strided_slice %168 {offsets = [0, 6], sizes = [32, 1], strides = [1, 1]} : vector<32x16xf32> to vector<32x1xf32>
    %cst_84 = arith.constant 1.000000e+00 : f32
    %224 = vector.broadcast %cst_84 : f32 to vector<32x1xf32>
    %225 = arith.subf %223, %224 : vector<32x1xf32>
    %cst_85 = arith.constant 9.99999984E+17 : f32
    %226 = vector.broadcast %cst_85 : f32 to vector<32x1xf32>
    %227 = arith.mulf %225, %226 : vector<32x1xf32>
    %228 = vector.broadcast %227 : vector<32x1xf32> to vector<32x128xf32>
    %229 = arith.addf %166, %228 : vector<32x128xf32>
    %cst_86 = arith.constant dense<0xFF800000> : vector<128xf32>
    %230 = vector.multi_reduction <maximumf>, %229, %cst_86 [0] : vector<32x128xf32> to vector<128xf32>
    %231 = vector.shape_cast %230 : vector<128xf32> to vector<1x128xf32>
    %232 = vector.extract_strided_slice %168 {offsets = [0, 7], sizes = [32, 1], strides = [1, 1]} : vector<32x16xf32> to vector<32x1xf32>
    %cst_87 = arith.constant 1.000000e+00 : f32
    %233 = vector.broadcast %cst_87 : f32 to vector<32x1xf32>
    %234 = arith.subf %232, %233 : vector<32x1xf32>
    %cst_88 = arith.constant 9.99999984E+17 : f32
    %235 = vector.broadcast %cst_88 : f32 to vector<32x1xf32>
    %236 = arith.mulf %234, %235 : vector<32x1xf32>
    %237 = vector.broadcast %236 : vector<32x1xf32> to vector<32x128xf32>
    %238 = arith.addf %166, %237 : vector<32x128xf32>
    %cst_89 = arith.constant dense<0xFF800000> : vector<128xf32>
    %239 = vector.multi_reduction <maximumf>, %238, %cst_89 [0] : vector<32x128xf32> to vector<128xf32>
    %240 = vector.shape_cast %239 : vector<128xf32> to vector<1x128xf32>
    %241 = vector.extract_strided_slice %168 {offsets = [0, 8], sizes = [32, 1], strides = [1, 1]} : vector<32x16xf32> to vector<32x1xf32>
    %cst_90 = arith.constant 1.000000e+00 : f32
    %242 = vector.broadcast %cst_90 : f32 to vector<32x1xf32>
    %243 = arith.subf %241, %242 : vector<32x1xf32>
    %cst_91 = arith.constant 9.99999984E+17 : f32
    %244 = vector.broadcast %cst_91 : f32 to vector<32x1xf32>
    %245 = arith.mulf %243, %244 : vector<32x1xf32>
    %246 = vector.broadcast %245 : vector<32x1xf32> to vector<32x128xf32>
    %247 = arith.addf %166, %246 : vector<32x128xf32>
    %cst_92 = arith.constant dense<0xFF800000> : vector<128xf32>
    %248 = vector.multi_reduction <maximumf>, %247, %cst_92 [0] : vector<32x128xf32> to vector<128xf32>
    %249 = vector.shape_cast %248 : vector<128xf32> to vector<1x128xf32>
    %250 = vector.extract_strided_slice %168 {offsets = [0, 9], sizes = [32, 1], strides = [1, 1]} : vector<32x16xf32> to vector<32x1xf32>
    %cst_93 = arith.constant 1.000000e+00 : f32
    %251 = vector.broadcast %cst_93 : f32 to vector<32x1xf32>
    %252 = arith.subf %250, %251 : vector<32x1xf32>
    %cst_94 = arith.constant 9.99999984E+17 : f32
    %253 = vector.broadcast %cst_94 : f32 to vector<32x1xf32>
    %254 = arith.mulf %252, %253 : vector<32x1xf32>
    %255 = vector.broadcast %254 : vector<32x1xf32> to vector<32x128xf32>
    %256 = arith.addf %166, %255 : vector<32x128xf32>
    %cst_95 = arith.constant dense<0xFF800000> : vector<128xf32>
    %257 = vector.multi_reduction <maximumf>, %256, %cst_95 [0] : vector<32x128xf32> to vector<128xf32>
    %258 = vector.shape_cast %257 : vector<128xf32> to vector<1x128xf32>
    %259 = vector.extract_strided_slice %168 {offsets = [0, 10], sizes = [32, 1], strides = [1, 1]} : vector<32x16xf32> to vector<32x1xf32>
    %cst_96 = arith.constant 1.000000e+00 : f32
    %260 = vector.broadcast %cst_96 : f32 to vector<32x1xf32>
    %261 = arith.subf %259, %260 : vector<32x1xf32>
    %cst_97 = arith.constant 9.99999984E+17 : f32
    %262 = vector.broadcast %cst_97 : f32 to vector<32x1xf32>
    %263 = arith.mulf %261, %262 : vector<32x1xf32>
    %264 = vector.broadcast %263 : vector<32x1xf32> to vector<32x128xf32>
    %265 = arith.addf %166, %264 : vector<32x128xf32>
    %cst_98 = arith.constant dense<0xFF800000> : vector<128xf32>
    %266 = vector.multi_reduction <maximumf>, %265, %cst_98 [0] : vector<32x128xf32> to vector<128xf32>
    %267 = vector.shape_cast %266 : vector<128xf32> to vector<1x128xf32>
    %268 = vector.extract_strided_slice %168 {offsets = [0, 11], sizes = [32, 1], strides = [1, 1]} : vector<32x16xf32> to vector<32x1xf32>
    %cst_99 = arith.constant 1.000000e+00 : f32
    %269 = vector.broadcast %cst_99 : f32 to vector<32x1xf32>
    %270 = arith.subf %268, %269 : vector<32x1xf32>
    %cst_100 = arith.constant 9.99999984E+17 : f32
    %271 = vector.broadcast %cst_100 : f32 to vector<32x1xf32>
    %272 = arith.mulf %270, %271 : vector<32x1xf32>
    %273 = vector.broadcast %272 : vector<32x1xf32> to vector<32x128xf32>
    %274 = arith.addf %166, %273 : vector<32x128xf32>
    %cst_101 = arith.constant dense<0xFF800000> : vector<128xf32>
    %275 = vector.multi_reduction <maximumf>, %274, %cst_101 [0] : vector<32x128xf32> to vector<128xf32>
    %276 = vector.shape_cast %275 : vector<128xf32> to vector<1x128xf32>
    %277 = vector.extract_strided_slice %168 {offsets = [0, 12], sizes = [32, 1], strides = [1, 1]} : vector<32x16xf32> to vector<32x1xf32>
    %cst_102 = arith.constant 1.000000e+00 : f32
    %278 = vector.broadcast %cst_102 : f32 to vector<32x1xf32>
    %279 = arith.subf %277, %278 : vector<32x1xf32>
    %cst_103 = arith.constant 9.99999984E+17 : f32
    %280 = vector.broadcast %cst_103 : f32 to vector<32x1xf32>
    %281 = arith.mulf %279, %280 : vector<32x1xf32>
    %282 = vector.broadcast %281 : vector<32x1xf32> to vector<32x128xf32>
    %283 = arith.addf %166, %282 : vector<32x128xf32>
    %cst_104 = arith.constant dense<0xFF800000> : vector<128xf32>
    %284 = vector.multi_reduction <maximumf>, %283, %cst_104 [0] : vector<32x128xf32> to vector<128xf32>
    %285 = vector.shape_cast %284 : vector<128xf32> to vector<1x128xf32>
    %286 = vector.extract_strided_slice %168 {offsets = [0, 13], sizes = [32, 1], strides = [1, 1]} : vector<32x16xf32> to vector<32x1xf32>
    %cst_105 = arith.constant 1.000000e+00 : f32
    %287 = vector.broadcast %cst_105 : f32 to vector<32x1xf32>
    %288 = arith.subf %286, %287 : vector<32x1xf32>
    %cst_106 = arith.constant 9.99999984E+17 : f32
    %289 = vector.broadcast %cst_106 : f32 to vector<32x1xf32>
    %290 = arith.mulf %288, %289 : vector<32x1xf32>
    %291 = vector.broadcast %290 : vector<32x1xf32> to vector<32x128xf32>
    %292 = arith.addf %166, %291 : vector<32x128xf32>
    %cst_107 = arith.constant dense<0xFF800000> : vector<128xf32>
    %293 = vector.multi_reduction <maximumf>, %292, %cst_107 [0] : vector<32x128xf32> to vector<128xf32>
    %294 = vector.shape_cast %293 : vector<128xf32> to vector<1x128xf32>
    %295 = vector.extract_strided_slice %168 {offsets = [0, 14], sizes = [32, 1], strides = [1, 1]} : vector<32x16xf32> to vector<32x1xf32>
    %cst_108 = arith.constant 1.000000e+00 : f32
    %296 = vector.broadcast %cst_108 : f32 to vector<32x1xf32>
    %297 = arith.subf %295, %296 : vector<32x1xf32>
    %cst_109 = arith.constant 9.99999984E+17 : f32
    %298 = vector.broadcast %cst_109 : f32 to vector<32x1xf32>
    %299 = arith.mulf %297, %298 : vector<32x1xf32>
    %300 = vector.broadcast %299 : vector<32x1xf32> to vector<32x128xf32>
    %301 = arith.addf %166, %300 : vector<32x128xf32>
    %cst_110 = arith.constant dense<0xFF800000> : vector<128xf32>
    %302 = vector.multi_reduction <maximumf>, %301, %cst_110 [0] : vector<32x128xf32> to vector<128xf32>
    %303 = vector.shape_cast %302 : vector<128xf32> to vector<1x128xf32>
    %304 = vector.extract_strided_slice %168 {offsets = [0, 15], sizes = [32, 1], strides = [1, 1]} : vector<32x16xf32> to vector<32x1xf32>
    %cst_111 = arith.constant 1.000000e+00 : f32
    %305 = vector.broadcast %cst_111 : f32 to vector<32x1xf32>
    %306 = arith.subf %304, %305 : vector<32x1xf32>
    %cst_112 = arith.constant 9.99999984E+17 : f32
    %307 = vector.broadcast %cst_112 : f32 to vector<32x1xf32>
    %308 = arith.mulf %306, %307 : vector<32x1xf32>
    %309 = vector.broadcast %308 : vector<32x1xf32> to vector<32x128xf32>
    %310 = arith.addf %166, %309 : vector<32x128xf32>
    %cst_113 = arith.constant dense<0xFF800000> : vector<128xf32>
    %311 = vector.multi_reduction <maximumf>, %310, %cst_113 [0] : vector<32x128xf32> to vector<128xf32>
    %312 = vector.shape_cast %311 : vector<128xf32> to vector<1x128xf32>
    %313 = tpu.concatenate %177, %186, %195, %204, %213, %222, %231, %240, %249, %258, %267, %276, %285, %294, %303, %312 in 0 : vector<1x128xf32>, vector<1x128xf32>, vector<1x128xf32>, vector<1x128xf32>, vector<1x128xf32>, vector<1x128xf32>, vector<1x128xf32>, vector<1x128xf32>, vector<1x128xf32>, vector<1x128xf32>, vector<1x128xf32>, vector<1x128xf32>, vector<1x128xf32>, vector<1x128xf32>, vector<1x128xf32>, vector<1x128xf32> -> vector<16x128xf32>
    %314 = vector.extract_strided_slice %8 {offsets = [16, 0], sizes = [16, 1], strides = [1, 1]} : vector<32x1xf32> to vector<16x1xf32>
    %315 = vector.broadcast %314 : vector<16x1xf32> to vector<16x128xf32>
    %316 = arith.mulf %313, %315 : vector<16x128xf32>
    %317 = arith.truncf %316 : vector<16x128xf32> to vector<16x128xbf16>
    %c16 = arith.constant 16 : index
    %c0_114 = arith.constant 0 : index
    %318 = vector.load %arg13[%c16, %c0_114] : memref<32x128xbf16, #tpu.memory_space<vmem>>, vector<16x128xbf16>
    tpu.vector_store %arg13[%c16, %c0_114], %317 {strides = array<i32>} : memref<32x128xbf16, #tpu.memory_space<vmem>>, vector<16x128xbf16>,
    %c0_115 = arith.constant 0 : index
    %c0_116 = arith.constant 0 : index
    %319 = vector.load %arg13[%c0_115, %c0_116] : memref<32x128xbf16, #tpu.memory_space<vmem>>, vector<32x128xbf16>
    %c0_117 = arith.constant 0 : index
    %c0_118 = arith.constant 0 : index
    %320 = vector.load %arg7[%c0_117, %c0_118] : memref<128x128xbf16, #tpu.memory_space<vmem>>, vector<128x128xbf16>
    %cst_119 = arith.constant dense<0.000000e+00> : vector<32x128xf32>
    %321 = tpu.matmul %319, %320, %cst_119 {dimension_numbers = #tpu.dot_dimension_numbers<[1], [0], [0], [1], [0, 0, 1, 1], [], []>} : vector<32x128xbf16>, vector<128x128xbf16>, vector<32x128xf32> -> vector<32x128xf32>
    %c0_120 = arith.constant 0 : index
    %c0_121 = arith.constant 0 : index
    %322 = vector.load %arg8[%c0_120, %c0_121] : memref<1x128xf32, #tpu.memory_space<vmem>>, vector<1x128xf32>
    %323 = vector.broadcast %322 : vector<1x128xf32> to vector<32x128xf32>
    %324 = arith.addf %321, %323 : vector<32x128xf32>
    %325 = vector.broadcast %8 : vector<32x1xf32> to vector<32x128xf32>
    %326 = arith.mulf %324, %325 : vector<32x128xf32>
    %327 = arith.truncf %326 : vector<32x128xf32> to vector<32x128xbf16>
    %c0_122 = arith.constant 0 : index
    %c0_123 = arith.constant 0 : index
    %328 = vector.load %arg14[%c0_122, %c0_123] : memref<32x128xbf16, #tpu.memory_space<vmem>>, vector<32x128xbf16>
    tpu.vector_store %arg14[%c0_122, %c0_123], %327 {strides = array<i32>} : memref<32x128xbf16, #tpu.memory_space<vmem>>, vector<32x128xbf16>,
    %c0_124 = arith.constant 0 : index
    %c0_125 = arith.constant 0 : index
    %c0_126 = arith.constant 0 : index
    %329 = vector.load %arg5[%c0_124, %c0_125, %c0_126] : memref<1x32x32xf32, #tpu.memory_space<vmem>>, vector<1x32x32xf32>
    %330 = vector.shape_cast %329 : vector<1x32x32xf32> to vector<32x32xf32>
    %331 = arith.truncf %330 : vector<32x32xf32> to vector<32x32xbf16>
    %c0_127 = arith.constant 0 : index
    %c0_128 = arith.constant 0 : index
    %332 = vector.load %arg14[%c0_127, %c0_128] : memref<32x128xbf16, #tpu.memory_space<vmem>>, vector<32x128xbf16>
    %cst_129 = arith.constant dense<0.000000e+00> : vector<32x128xf32>
    %333 = tpu.matmul %331, %332, %cst_129 {dimension_numbers = #tpu.dot_dimension_numbers<[1], [0], [0], [1], [0, 0, 1, 1], [], []>} : vector<32x32xbf16>, vector<32x128xbf16>, vector<32x128xf32> -> vector<32x128xf32>
    %334 = vector.broadcast %6 : vector<1x128xf32> to vector<32x128xf32>
    %335 = arith.addf %333, %334 : vector<32x128xf32>
    %336 = arith.truncf %335 : vector<32x128xf32> to vector<32x128xbf16>
    %c0_130 = arith.constant 0 : index
    %c0_131 = arith.constant 0 : index
    %337 = vector.load %arg15[%c0_130, %c0_131] : memref<32x128xbf16, #tpu.memory_space<vmem>>, vector<32x128xbf16>
    tpu.vector_store %arg15[%c0_130, %c0_131], %336 {strides = array<i32>} : memref<32x128xbf16, #tpu.memory_space<vmem>>, vector<32x128xbf16>,
    %c0_132 = arith.constant 0 : index
    %c0_133 = arith.constant 0 : index
    %c0_134 = arith.constant 0 : index
    %338 = vector.load %arg6[%c0_132, %c0_133, %c0_134] : memref<1x32x32xf32, #tpu.memory_space<vmem>>, vector<1x32x32xf32>
    %339 = vector.shape_cast %338 : vector<1x32x32xf32> to vector<32x32xf32>
    %340 = arith.truncf %339 : vector<32x32xf32> to vector<32x32xbf16>
    %c0_135 = arith.constant 0 : index
    %c0_136 = arith.constant 0 : index
    %341 = vector.load %arg14[%c0_135, %c0_136] : memref<32x128xbf16, #tpu.memory_space<vmem>>, vector<32x128xbf16>
    %cst_137 = arith.constant dense<0.000000e+00> : vector<32x128xf32>
    %342 = tpu.matmul %340, %341, %cst_137 {dimension_numbers = #tpu.dot_dimension_numbers<[1], [0], [0], [1], [0, 0, 1, 1], [], []>} : vector<32x32xbf16>, vector<32x128xbf16>, vector<32x128xf32> -> vector<32x128xf32>
    %343 = vector.broadcast %3 : vector<1x128xf32> to vector<32x128xf32>
    %344 = arith.addf %342, %343 : vector<32x128xf32>
    %345 = arith.truncf %344 : vector<32x128xf32> to vector<32x128xbf16>
    %c0_138 = arith.constant 0 : index
    %c0_139 = arith.constant 0 : index
    %346 = vector.load %arg16[%c0_138, %c0_139] : memref<32x128xbf16, #tpu.memory_space<vmem>>, vector<32x128xbf16>
    tpu.vector_store %arg16[%c0_138, %c0_139], %345 {strides = array<i32>} : memref<32x128xbf16, #tpu.memory_space<vmem>>, vector<32x128xbf16>,
    %c0_140 = arith.constant 0 : index
    %c0_141 = arith.constant 0 : index
    %347 = vector.load %arg14[%c0_140, %c0_141] : memref<32x128xbf16, #tpu.memory_space<vmem>>, vector<32x128xbf16>
    %c0_142 = arith.constant 0 : index
    %c0_143 = arith.constant 0 : index
    %348 = vector.load %arg9[%c0_142, %c0_143] : memref<384x128xbf16, #tpu.memory_space<vmem>>, vector<128x128xbf16>
    %cst_144 = arith.constant dense<0.000000e+00> : vector<32x128xf32>
    %349 = tpu.matmul %347, %348, %cst_144 {dimension_numbers = #tpu.dot_dimension_numbers<[1], [0], [0], [1], [0, 0, 1, 1], [], []>} : vector<32x128xbf16>, vector<128x128xbf16>, vector<32x128xf32> -> vector<32x128xf32>
    %c0_145 = arith.constant 0 : index
    %c0_146 = arith.constant 0 : index
    %350 = vector.load %arg15[%c0_145, %c0_146] : memref<32x128xbf16, #tpu.memory_space<vmem>>, vector<32x128xbf16>
    %c128 = arith.constant 128 : index
    %c0_147 = arith.constant 0 : index
    %351 = vector.load %arg9[%c128, %c0_147] : memref<384x128xbf16, #tpu.memory_space<vmem>>, vector<128x128xbf16>
    %cst_148 = arith.constant dense<0.000000e+00> : vector<32x128xf32>
    %352 = tpu.matmul %350, %351, %cst_148 {dimension_numbers = #tpu.dot_dimension_numbers<[1], [0], [0], [1], [0, 0, 1, 1], [], []>} : vector<32x128xbf16>, vector<128x128xbf16>, vector<32x128xf32> -> vector<32x128xf32>
    %353 = arith.addf %349, %352 : vector<32x128xf32>
    %c0_149 = arith.constant 0 : index
    %c0_150 = arith.constant 0 : index
    %354 = vector.load %arg16[%c0_149, %c0_150] : memref<32x128xbf16, #tpu.memory_space<vmem>>, vector<32x128xbf16>
    %c256 = arith.constant 256 : index
    %c0_151 = arith.constant 0 : index
    %355 = vector.load %arg9[%c256, %c0_151] : memref<384x128xbf16, #tpu.memory_space<vmem>>, vector<128x128xbf16>
    %cst_152 = arith.constant dense<0.000000e+00> : vector<32x128xf32>
    %356 = tpu.matmul %354, %355, %cst_152 {dimension_numbers = #tpu.dot_dimension_numbers<[1], [0], [0], [1], [0, 0, 1, 1], [], []>} : vector<32x128xbf16>, vector<128x128xbf16>, vector<32x128xf32> -> vector<32x128xf32>
    %357 = arith.addf %353, %356 : vector<32x128xf32>
    %c0_153 = arith.constant 0 : index
    %c0_154 = arith.constant 0 : index
    %358 = vector.load %arg10[%c0_153, %c0_154] : memref<1x128xf32, #tpu.memory_space<vmem>>, vector<1x128xf32>
    %359 = vector.broadcast %358 : vector<1x128xf32> to vector<32x128xf32>
    %360 = arith.addf %357, %359 : vector<32x128xf32>
    %361 = math.tanh %360 : vector<32x128xf32>
    %362 = arith.truncf %361 : vector<32x128xf32> to vector<32x128xbf16>
    %c0_155 = arith.constant 0 : index
    %c0_156 = arith.constant 0 : index
    %363 = vector.load %arg17[%c0_155, %c0_156] : memref<32x128xbf16, #tpu.memory_space<vmem>>, vector<32x128xbf16>
    tpu.vector_store %arg17[%c0_155, %c0_156], %362 {strides = array<i32>} : memref<32x128xbf16, #tpu.memory_space<vmem>>, vector<32x128xbf16>,
    %c0_157 = arith.constant 0 : index
    %c0_158 = arith.constant 0 : index
    %c0_159 = arith.constant 0 : index
    %364 = vector.load %arg2[%c0_157, %c0_158, %c0_159] : memref<2x32x16xf32, #tpu.memory_space<vmem>>, vector<1x32x16xf32>
    %365 = vector.shape_cast %364 : vector<1x32x16xf32> to vector<32x16xf32>
    %366 = arith.truncf %365 : vector<32x16xf32> to vector<32x16xbf16>
    %c0_160 = arith.constant 0 : index
    %c0_161 = arith.constant 0 : index
    %367 = vector.load %arg17[%c0_160, %c0_161] : memref<32x128xbf16, #tpu.memory_space<vmem>>, vector<16x128xbf16>
    %cst_162 = arith.constant dense<0.000000e+00> : vector<32x128xf32>
    %368 = tpu.matmul %366, %367, %cst_162 {dimension_numbers = #tpu.dot_dimension_numbers<[1], [0], [0], [1], [0, 0, 1, 1], [], []>} : vector<32x16xbf16>, vector<16x128xbf16>, vector<32x128xf32> -> vector<32x128xf32>
    %c0_163 = arith.constant 0 : index
    %c0_164 = arith.constant 0 : index
    %c0_165 = arith.constant 0 : index
    %369 = vector.load %arg1[%c0_163, %c0_164, %c0_165] : memref<2x32x128xbf16, #tpu.memory_space<vmem>>, vector<1x32x128xbf16>
    %370 = vector.shape_cast %369 : vector<1x32x128xbf16> to vector<32x128xbf16>
    %371 = arith.extf %370 : vector<32x128xbf16> to vector<32x128xf32>
    %c0_166 = arith.constant 0 : index
    %c0_167 = arith.constant 0 : index
    %c0_168 = arith.constant 0 : index
    %372 = vector.load %arg3[%c0_166, %c0_167, %c0_168] : memref<2x32x1xf32, #tpu.memory_space<vmem>>, vector<1x32x1xf32>
    %373 = vector.shape_cast %372 : vector<1x32x1xf32> to vector<32x1xf32>
    %374 = vector.broadcast %373 : vector<32x1xf32> to vector<32x128xf32>
    %375 = arith.mulf %371, %374 : vector<32x128xf32>
    %376 = arith.addf %375, %368 : vector<32x128xf32>
    %c0_169 = arith.constant 0 : index
    %c0_170 = arith.constant 0 : index
    %c0_171 = arith.constant 0 : index
    %377 = vector.load %arg12[%c0_169, %c0_170, %c0_171] : memref<2x32x128xf32, #tpu.memory_space<vmem>>, vector<1x32x128xf32>
    %378 = vector.shape_cast %377 : vector<1x32x128xf32> to vector<32x128xf32>
    %379 = vector.shape_cast %376 : vector<32x128xf32> to vector<1x32x128xf32>
    tpu.vector_store %arg12[%c0_169, %c0_170, %c0_171], %379 {strides = array<i32>} : memref<2x32x128xf32, #tpu.memory_space<vmem>>, vector<1x32x128xf32>,
    %c1_172 = arith.constant 1 : index
    %c0_173 = arith.constant 0 : index
    %c0_174 = arith.constant 0 : index
    %380 = vector.load %arg2[%c1_172, %c0_173, %c0_174] : memref<2x32x16xf32, #tpu.memory_space<vmem>>, vector<1x32x16xf32>
    %381 = vector.shape_cast %380 : vector<1x32x16xf32> to vector<32x16xf32>
    %382 = arith.truncf %381 : vector<32x16xf32> to vector<32x16xbf16>
    %c16_175 = arith.constant 16 : index
    %c0_176 = arith.constant 0 : index
    %383 = vector.load %arg17[%c16_175, %c0_176] : memref<32x128xbf16, #tpu.memory_space<vmem>>, vector<16x128xbf16>
    %cst_177 = arith.constant dense<0.000000e+00> : vector<32x128xf32>
    %384 = tpu.matmul %382, %383, %cst_177 {dimension_numbers = #tpu.dot_dimension_numbers<[1], [0], [0], [1], [0, 0, 1, 1], [], []>} : vector<32x16xbf16>, vector<16x128xbf16>, vector<32x128xf32> -> vector<32x128xf32>
    %c1_178 = arith.constant 1 : index
    %c0_179 = arith.constant 0 : index
    %c0_180 = arith.constant 0 : index
    %385 = vector.load %arg1[%c1_178, %c0_179, %c0_180] : memref<2x32x128xbf16, #tpu.memory_space<vmem>>, vector<1x32x128xbf16>
    %386 = vector.shape_cast %385 : vector<1x32x128xbf16> to vector<32x128xbf16>
    %387 = arith.extf %386 : vector<32x128xbf16> to vector<32x128xf32>
    %c1_181 = arith.constant 1 : index
    %c0_182 = arith.constant 0 : index
    %c0_183 = arith.constant 0 : index
    %388 = vector.load %arg3[%c1_181, %c0_182, %c0_183] : memref<2x32x1xf32, #tpu.memory_space<vmem>>, vector<1x32x1xf32>
    %389 = vector.shape_cast %388 : vector<1x32x1xf32> to vector<32x1xf32>
    %390 = vector.broadcast %389 : vector<32x1xf32> to vector<32x128xf32>
    %391 = arith.mulf %387, %390 : vector<32x128xf32>
    %392 = arith.addf %391, %384 : vector<32x128xf32>
    %c1_184 = arith.constant 1 : index
    %c0_185 = arith.constant 0 : index
    %c0_186 = arith.constant 0 : index
    %393 = vector.load %arg12[%c1_184, %c0_185, %c0_186] : memref<2x32x128xf32, #tpu.memory_space<vmem>>, vector<1x32x128xf32>
    %394 = vector.shape_cast %393 : vector<1x32x128xf32> to vector<32x128xf32>
    %395 = vector.shape_cast %392 : vector<32x128xf32> to vector<1x32x128xf32>
    tpu.vector_store %arg12[%c1_184, %c0_185, %c0_186], %395 {strides = array<i32>} : memref<2x32x128xf32, #tpu.memory_space<vmem>>, vector<1x32x128xf32>,
    return
  }
  func.func @transform_0(%arg0: i32) -> (i32, i32, i32) {
    %c0_i32 = arith.constant 0 : i32
    %c0_i32_0 = arith.constant 0 : i32
    %c0_i32_1 = arith.constant 0 : i32
    return %arg0, %c0_i32, %c0_i32_0 : i32, i32, i32
  }
  func.func @transform_1(%arg0: i32) -> (i32, i32, i32) {
    %c0_i32 = arith.constant 0 : i32
    %c0_i32_0 = arith.constant 0 : i32
    %c0_i32_1 = arith.constant 0 : i32
    return %arg0, %c0_i32, %c0_i32_0 : i32, i32, i32
  }
  func.func @transform_2(%arg0: i32) -> (i32, i32, i32) {
    %c0_i32 = arith.constant 0 : i32
    %c0_i32_0 = arith.constant 0 : i32
    %c0_i32_1 = arith.constant 0 : i32
    return %arg0, %c0_i32, %c0_i32_0 : i32, i32, i32
  }
  func.func @transform_3(%arg0: i32) -> (i32, i32, i32) {
    %c0_i32 = arith.constant 0 : i32
    %c0_i32_0 = arith.constant 0 : i32
    %c0_i32_1 = arith.constant 0 : i32
    return %arg0, %c0_i32, %c0_i32_0 : i32, i32, i32
  }
  func.func @transform_4(%arg0: i32) -> (i32, i32, i32) {
    %c0_i32 = arith.constant 0 : i32
    %c0_i32_0 = arith.constant 0 : i32
    %c0_i32_1 = arith.constant 0 : i32
    return %arg0, %c0_i32, %c0_i32_0 : i32, i32, i32
  }
  func.func @transform_5(%arg0: i32) -> (i32, i32, i32) {
    %c0_i32 = arith.constant 0 : i32
    %c0_i32_0 = arith.constant 0 : i32
    %c0_i32_1 = arith.constant 0 : i32
    return %arg0, %c0_i32, %c0_i32_0 : i32, i32, i32
  }
  func.func @transform_6(%arg0: i32) -> (i32, i32) {
    %c0_i32 = arith.constant 0 : i32
    %c0_i32_0 = arith.constant 0 : i32
    %c0_i32_1 = arith.constant 0 : i32
    return %c0_i32, %c0_i32_0 : i32, i32
  }
  func.func @transform_7(%arg0: i32) -> (i32, i32) {
    %c0_i32 = arith.constant 0 : i32
    %c0_i32_0 = arith.constant 0 : i32
    %c0_i32_1 = arith.constant 0 : i32
    return %c0_i32, %c0_i32_0 : i32, i32
  }
  func.func @transform_8(%arg0: i32) -> (i32, i32) {
    %c0_i32 = arith.constant 0 : i32
    %c0_i32_0 = arith.constant 0 : i32
    %c0_i32_1 = arith.constant 0 : i32
    return %c0_i32, %c0_i32_0 : i32, i32
  }
  func.func @transform_9(%arg0: i32) -> (i32, i32) {
    %c0_i32 = arith.constant 0 : i32
    %c0_i32_0 = arith.constant 0 : i32
    %c0_i32_1 = arith.constant 0 : i32
    return %c0_i32, %c0_i32_0 : i32, i32
  }
  func.func @transform_10(%arg0: i32) -> (i32, i32) {
    %c0_i32 = arith.constant 0 : i32
    %c0_i32_0 = arith.constant 0 : i32
    %c0_i32_1 = arith.constant 0 : i32
    return %c0_i32, %c0_i32_0 : i32, i32
  }
  func.func @transform_11(%arg0: i32) -> (i32, i32, i32) {
    %c0_i32 = arith.constant 0 : i32
    %c0_i32_0 = arith.constant 0 : i32
    %c0_i32_1 = arith.constant 0 : i32
    return %arg0, %c0_i32, %c0_i32_0 : i32, i32, i32
  }
}

</mosaic_0001>

<bundles_post_ra>
// kernel: tpu_custom_call.1
= control target key start
LH: loop header
LB: loop body
LE: loop exit
PB: predicated region body
PF: predicated region fallthrough
CT: control target
= control target key end

     0   :  { %16 = vsyncpa [#allocation8], 0  ;;  %s3355_s0 = inlined_call_operand.vmem [shape: bf16[2,32,128], index: 0, kind: input, shape index: {}]   ;;  %s3356_s1 = inlined_call_operand.vmem [shape: f32[2,32,16], index: 1, kind: input, shape index: {}]   ;;  %s3357_s2 = inlined_call_operand.vmem [shape: f32[2,32,1], index: 2, kind: input, shape index: {}]   ;;  %s3358_s3 = inlined_call_operand.vmem [shape: f32[1,32,1], index: 3, kind: input, shape index: {}]   ;;  %s3359_s4 = inlined_call_operand.hbm [shape: f32[1,32,32], index: 4, kind: input, shape index: {}]   ;;  %s3360_s5 = inlined_call_operand.hbm [shape: f32[1,32,32], index: 5, kind: input, shape index: {}]   ;;  %s3361_s6 = inlined_call_operand.hbm [shape: bf16[128,128], index: 6, kind: input, shape index: {}]   ;;  %s3362_s7 = inlined_call_operand.vmem [shape: f32[1,128], index: 7, kind: input, shape index: {}]   ;;  %s3363_s8 = inlined_call_operand.vmem [shape: bf16[384,128], index: 8, kind: input, shape index: {}]   ;;  %s3364_s9 = inlined_call_operand.vmem [shape: f32[1,128], index: 9, kind: input, shape index: {}]   ;;  %s3365_s10 = inlined_call_operand.vmem [shape: f32[2,128], index: 10, kind: input, shape index: {}]   ;;  %s3366_s11 = inlined_call_operand.hbm [shape: f32[2,32,128], index: 11, kind: output, shape index: {}]  }
   0x1   :  { %17 = vsyncpa [#allocation11], 0 }
   0x2   :  { %18 = vsyncpa [#allocation9], 0  ;;  %s2488_s17 = smov [#allocation10]   ;;  %s2489_s19 = smov [#allocation7]  }
   0x3   :  { %s44_s18 = sshll.u32 %s2488_s17, 4  ;;  %s32_s20 = sshll.u32 %s2489_s19, 4  ;;  %s45_s18 = int_to_ptr.vmem [resolvable:$true] %s44_s18  ;;  %s2572_s20 = int_to_ptr.vmem [resolvable:$true] %s32_s20 }
   0x4   :  { %s2394_s23 = scalar_lea.hbm %s3360_s5, 512 }
   0x5   :  { %p2395_p0 = scmp.ne.s32.totalorder %s3360_s5, %s2394_s23  ;;  %p2398_p1 = scmp.lt.u32.totalorder %s2394_s23, %s3360_s5 }
   0x7   :  { %p2400_p2 = pnand %p2398_p1, %p2395_p0 }
   0x9   :  { %2403 = shalt.err (!%p2400_p2)
}
   0xa   :  { %s2404_s28 = scalar_lea.vmem %s45_s18, 512  ;;  %p2409_p4 = scmp.lt.s32.totalorder %s45_s18, %s45_s18 }
   0xb   :  { %p2405_p3 = scmp.ne.s32.totalorder %s45_s18, %s2404_s28  ;;  %p2410_p5 = scmp.lt.s32.totalorder %s2404_s28, %s2404_s28 }
   0xd   :  { %p2411_p6 = por %p2410_p5, %p2409_p4 }
   0xf   :  { %p2412_p7 = pnand %p2411_p6, %p2405_p3 }
  0x11   :  { %2415 = shalt.err (!%p2412_p7)
}
  0x12   :  { %s2490_s29 = smov 128   ;;  %s2491_s30 = smov 8  }
  0x13   :  { %50 = dma.hbm_to_vmem [thread:$0]  %s3360_s5, 512, %s45_s18, [#allocation11], %s2490_s29, %s2490_s29, %s2491_s30  }
  0x14   :  { %s2416_s16 = scalar_lea.hbm %s3359_s4, 512 }
  0x15   :  { %p2417_p8 = scmp.ne.s32.totalorder %s3359_s4, %s2416_s16  ;;  %p2420_p9 = scmp.lt.u32.totalorder %s2416_s16, %s3359_s4 }
  0x17   :  { %p2422_p10 = pnand %p2420_p9, %p2417_p8 }
  0x19   :  { %2425 = shalt.err (!%p2422_p10)
}
  0x1a   :  { %s2426_s23 = scalar_lea.vmem %s2572_s20, 512  ;;  %p2431_p12 = scmp.lt.s32.totalorder %s2572_s20, %s2572_s20 }
  0x1b   :  { %p2427_p11 = scmp.ne.s32.totalorder %s2572_s20, %s2426_s23  ;;  %p2432_p13 = scmp.lt.s32.totalorder %s2426_s23, %s2426_s23 }
  0x1d   :  { %p2433_p0 = por %p2432_p13, %p2431_p12 }
  0x1f   :  { %p2434_p1 = pnand %p2433_p0, %p2427_p11 }
  0x21   :  { %2437 = shalt.err (!%p2434_p1)
}
  0x22   :  { %38 = dma.hbm_to_vmem [thread:$0]  %s3359_s4, 512, %s2572_s20, [#allocation8], %s2490_s29, %s2490_s29, %s2491_s30  }
  0x23   :  { %s2492_s24 = smov [#allocation12]   ;;  %s2438_s28 = scalar_lea.hbm %s3361_s6, 1024 }
  0x24   :  { %s56_s25 = sshll.u32 %s2492_s24, 4  ;;  %p2439_p2 = scmp.ne.s32.totalorder %s3361_s6, %s2438_s28  ;;  %s57_s25 = int_to_ptr.vmem [resolvable:$true] %s56_s25 }
  0x25   :  { %p2442_p3 = scmp.lt.u32.totalorder %s2438_s28, %s3361_s6 }
  0x27   :  { %p2444_p4 = pnand %p2442_p3, %p2439_p2 }
  0x29   :  { %2447 = shalt.err (!%p2444_p4)
}
  0x2a   :  { %s2448_s16 = scalar_lea.vmem %s57_s25, 1024  ;;  %p2453_p6 = scmp.lt.s32.totalorder %s57_s25, %s57_s25 }
  0x2b   :  { %p2449_p5 = scmp.ne.s32.totalorder %s57_s25, %s2448_s16  ;;  %p2454_p7 = scmp.lt.s32.totalorder %s2448_s16, %s2448_s16 }
  0x2d   :  { %p2455_p8 = por %p2454_p7, %p2453_p6 }
  0x2f   :  { %p2456_p9 = pnand %p2455_p8, %p2449_p5 }
  0x31   :  { %2459 = shalt.err (!%p2456_p9)
}
  0x32   :  { %s2493_s4 = smov 64   ;;  %s2494_s20 = smov 4  }
  0x33   :  { %62 = dma.hbm_to_vmem [thread:$0]  %s3361_s6, 1024, %s57_s25, [#allocation11], %s2493_s4, %s2493_s4, %s2494_s20  }
  0x34   :  { %2482 = dma.done.wait [#allocation8], 512  }
  0x35   :  { %2483 = vsyncadd [#allocation8], 4294966784 }
  0x36   :  { %2484 = dma.done.wait [#allocation11], 1536  }
  0x37   :  { %2485 = vsyncadd [#allocation11], 4294965760  ;;  %v2495_v0 = vmov 0   ;;  %v97_v1 = vld [vmem:[%s3356_s1 + $0x10] sm:$0xff]  ;;  %v95_v2 = vld [vmem:[%s3356_s1] sm:$0xff]  ;;  %v2496_v21 = vmov 1  }
  0x38   :  { %2305 = vset.pattern.permute.xlu1 %v2495_v0  ;;  %2304 = vset.pattern.permute.xlu0 %v2495_v0  ;;  %v98_v3 = vld [vmem:[%s3356_s1 + $0x18] sm:$0xff]  ;;  %v2004_v4 = vadd.f32 -1.0, %v97_v1  ;;  %v2002_v5 = vadd.f32 -1.0, %v95_v2  ;;  %v96_v7 = vld [vmem:[%s3356_s1 + $0x8] sm:$0xff]  ;;  %v2010_v9 = vld [vmem:[%s3356_s1 + $0x20] sm:$0xff]  ;;  %v2497_v22 = vmov 8  }
  0x39   :  { %v2005_v6 = vadd.f32 -1.0, %v98_v3  ;;  %v2011_v8 = vld [vmem:[%s3356_s1 + $0x28] sm:$0xff]  ;;  %v2003_v10 = vadd.f32 -1.0, %v96_v7  ;;  %v2014_v14 = vadd.f32 -1.0, %v2010_v9  ;;  %v2013_v16 = vld [vmem:[%s3356_s1 + $0x38] sm:$0xff]  ;;  %v2498_v24 = vmov 9  }
  0x3a   :  { %v2015_v11 = vadd.f32 -1.0, %v2011_v8  ;;  %v2641_v12 = vmul.f32 1e+18, %v2004_v4  ;;  %v2643_v13 = vmul.f32 1e+18, %v2002_v5  ;;  %v2017_v20 = vadd.f32 -1.0, %v2013_v16 }
  0x3b   :  { %v2645_v15 = vmul.f32 1e+18, %v2005_v6  ;;  %v2652_v17 = vmul.f32 1e+18, %v2003_v10  ;;  %v2656_v19 = vmul.f32 1e+18, %v2014_v14 }
  0x3c   :  { %119 = vperm.xlu1 %2305, %v2641_v12   ;;  %109 = vperm.xlu0 %2304, %v2643_v13   ;;  %v2654_v18 = vmul.f32 1e+18, %v2015_v11  ;;  %v2666_v23 = vmul.f32 1e+18, %v2017_v20  ;;  %v2499_v25 = vmov 2   ;;  %v2500_v26 = vmov 10  }
  0x3d   :  { %v2012_v27 = vld [vmem:[%s3356_s1 + $0x30] sm:$0xff]  ;;  %v2501_v30 = vmov 3   ;;  %v2502_v31 = vmov 11   ;;  %v2503_v32 = vmov 4   ;;  %v2504_v33 = vmov 12   ;;  %v2073_v49 = vld [vmem:[%s3355_s0] sm:$0xff]  }
  0x3e   :  { %v2016_v28 = vadd.f32 -1.0, %v2012_v27  ;;  %v2505_v38 = vmov 5   ;;  %v2506_v43 = vmov 13   ;;  %v2104_v51 = vld [vmem:[%s3355_s0 + $0x8] sm:$0xff]   ;;  %v2782_v53 = vunpack.c.l.bf16 %v2073_v49 }
  0x3f   :  { %v2779_v52 = vunpack.c.h.bf16 %v2104_v51  ;;  %v2784_v54 = vunpack.c.h.bf16 %v2073_v49  ;;  %v2786_v55 = vunpack.c.l.bf16 %v2104_v51  ;;  %v2507_v62 = vmov 6  }
  0x40   :  { %124 = vperm.xlu1 %2305, %v2645_v15   ;;  %114 = vperm.xlu0 %2304, %v2652_v17   ;;  %v2695_v29 = vmul.f32 1e+18, %v2016_v28  ;;  %v2508_v8 = vmov 14   ;;  %vm575_vm0 = vcmask 1040384   ;;  %vm577_vm1 = vcmask 1041408  }
  0x41   :  { %vm579_vm2 = vcmask 1042432   ;;  %vm581_vm3 = vcmask 1043456   ;;  %vm583_vm4 = vcmask 1044480   ;;  %vm585_vm5 = vcmask 1045504  }
  0x42   :  { %vm587_vm6 = vcmask 1046528   ;;  %vm1270_vm7 = vcmask 261120   ;;  %vm1776_vm8 = vcmask 130048  }
  0x44   :  { %2306 = vset.pattern.permute.xlu1 %v2496_v21  ;;  %639 = vperm.xlu0 %2304, %v2654_v18  }
  0x45   :  { %145 = vperm.xlu1 %2306, %v2652_v17  }
  0x48   :  { %2312 = vset.pattern.permute.xlu0 %v2496_v21 }
  0x49   :  { %149 = vperm.xlu1 %2306, %v2641_v12   ;;  %141 = vperm.xlu0 %2312, %v2643_v13  }
  0x4d   :  { %2307 = vset.pattern.permute.xlu1 %v2497_v22  ;;  %153 = vperm.xlu0 %2312, %v2645_v15  }
  0x4e   :  { %344 = vperm.xlu1 %2307, %v2643_v13  }
  0x51   :  { %666 = vperm.xlu0 %2312, %v2656_v19  }
  0x52   :  { %352 = vperm.xlu1 %2307, %v2641_v12  }
  0x55   :  { %678 = vperm.xlu0 %2312, %v2666_v23  }
  0x56   :  { %356 = vperm.xlu1 %2307, %v2645_v15  }
  0x59   :  { %2314 = vset.pattern.permute.xlu0 %v2497_v22 }
  0x5a   :  { %2308 = vset.pattern.permute.xlu1 %v2498_v24  ;;  %348 = vperm.xlu0 %2314, %v2652_v17  }
  0x5b   :  { %377 = vperm.xlu1 %2308, %v2652_v17  }
  0x5e   :  { %873 = vperm.xlu0 %2314, %v2654_v18  }
  0x5f   :  { %381 = vperm.xlu1 %2308, %v2641_v12  }
  0x62   :  { %2316 = vset.pattern.permute.xlu0 %v2498_v24 }
  0x63   :  { %2309 = vset.pattern.permute.xlu1 %v2499_v25  ;;  %373 = vperm.xlu0 %2316, %v2643_v13  }
  0x64   :  { %170 = vperm.xlu1 %2309, %v2643_v13  }
  0x67   :  { %385 = vperm.xlu0 %2316, %v2645_v15  }
  0x68   :  { %178 = vperm.xlu1 %2309, %v2641_v12  }
  0x6b   :  { %898 = vperm.xlu0 %2316, %v2656_v19  }
  0x6c   :  { %182 = vperm.xlu1 %2309, %v2645_v15  }
  0x6f   :  { %910 = vperm.xlu0 %2316, %v2666_v23  }
  0x70   :  { %2310 = vset.pattern.permute.xlu1 %v2500_v26 }
  0x71   :  { %406 = vperm.xlu1 %2310, %v2652_v17  }
  0x73   :  { %2318 = vset.pattern.permute.xlu0 %v2499_v25 }
  0x74   :  { %174 = vperm.xlu0 %2318, %v2652_v17  }
  0x75   :  { %410 = vperm.xlu1 %2310, %v2641_v12  }
  0x78   :  { %699 = vperm.xlu0 %2318, %v2654_v18  }
  0x79   :  { %2311 = vset.pattern.permute.xlu1 %v2495_v0 }
  0x7a   :  { %634 = vperm.xlu1 %2311, %v2656_v19  }
  0x7c   :  { %2322 = vset.pattern.permute.xlu0 %v2500_v26 }
  0x7d   :  { %402 = vperm.xlu0 %2322, %v2643_v13  }
  0x7e   :  { %644 = vperm.xlu1 %2311, %v2695_v29  }
  0x81   :  { %414 = vperm.xlu0 %2322, %v2645_v15  }
  0x82   :  { %649 = vperm.xlu1 %2311, %v2666_v23  }
  0x85   :  { %927 = vperm.xlu0 %2322, %v2656_v19  }
  0x86   :  { %2313 = vset.pattern.permute.xlu1 %v2496_v21 }
  0x87   :  { %670 = vperm.xlu1 %2313, %v2654_v18  }
  0x89   :  { %939 = vperm.xlu0 %2322, %v2666_v23  }
  0x8b   :  { %674 = vperm.xlu1 %2313, %v2695_v29  }
  0x8d   :  { %2324 = vset.pattern.permute.xlu0 %v2501_v30 }
  0x8e   :  { %203 = vperm.xlu0 %2324, %v2652_v17  }
  0x8f   :  { %2315 = vset.pattern.permute.xlu1 %v2497_v22 }
  0x90   :  { %869 = vperm.xlu1 %2315, %v2656_v19  }
  0x92   :  { %728 = vperm.xlu0 %2324, %v2654_v18  }
  0x94   :  { %877 = vperm.xlu1 %2315, %v2695_v29  }
  0x96   :  { %2328 = vset.pattern.permute.xlu0 %v2502_v31 }
  0x97   :  { %431 = vperm.xlu0 %2328, %v2643_v13  }
  0x98   :  { %881 = vperm.xlu1 %2315, %v2666_v23  }
  0x9b   :  { %443 = vperm.xlu0 %2328, %v2645_v15  }
  0x9c   :  { %2317 = vset.pattern.permute.xlu1 %v2498_v24 }
  0x9d   :  { %902 = vperm.xlu1 %2317, %v2654_v18  }
  0x9f   :  { %956 = vperm.xlu0 %2328, %v2656_v19  }
  0xa1   :  { %906 = vperm.xlu1 %2317, %v2695_v29  }
  0xa3   :  { %968 = vperm.xlu0 %2328, %v2666_v23  }
  0xa5   :  { %2319 = vset.pattern.permute.xlu1 %v2501_v30 }
  0xa6   :  { %199 = vperm.xlu1 %2319, %v2643_v13  }
  0xa7   :  { %2330 = vset.pattern.permute.xlu0 %v2503_v32 }
  0xa8   :  { %232 = vperm.xlu0 %2330, %v2652_v17  }
  0xaa   :  { %207 = vperm.xlu1 %2319, %v2641_v12  }
  0xac   :  { %757 = vperm.xlu0 %2330, %v2654_v18  }
  0xae   :  { %211 = vperm.xlu1 %2319, %v2645_v15  }
  0xb0   :  { %2334 = vset.pattern.permute.xlu0 %v2504_v33 }
  0xb1   :  { %460 = vperm.xlu0 %2334, %v2643_v13  }
  0xb2   :  { %2320 = vset.pattern.permute.xlu1 %v2502_v31 }
  0xb3   :  { %435 = vperm.xlu1 %2320, %v2652_v17  }
  0xb5   :  { %472 = vperm.xlu0 %2334, %v2645_v15  }
  0xb7   :  { %439 = vperm.xlu1 %2320, %v2641_v12  }
  0xb9   :  { %985 = vperm.xlu0 %2334, %v2656_v19  }
  0xbb   :  { %v2733_v34 = vpop.permute.xlu1 %119  ;;  %2321 = vset.pattern.permute.xlu1 %v2499_v25  ;;  %v2736_v35 = vpop.permute.xlu0 %109 }
  0xbc   :  { %695 = vperm.xlu1 %2321, %v2656_v19  }
  0xbd   :  { %997 = vperm.xlu0 %2334, %v2666_v23  }
  0xbf   :  { %v2740_v36 = vpop.permute.xlu1 %124  ;;  %v2742_v37 = vpop.permute.xlu0 %114 }
  0xc0   :  { %703 = vperm.xlu1 %2321, %v2695_v29  }
  0xc1   :  { %2336 = vset.pattern.permute.xlu0 %v2505_v38 }
  0xc2   :  { %261 = vperm.xlu0 %2336, %v2652_v17  }
  0xc3   :  { %v2747_v39 = vpop.permute.xlu0 %639 }
  0xc4   :  { %v2749_v40 = vpop.permute.xlu1 %145  ;;  %707 = vperm.xlu1 %2321, %v2666_v23  }
  0xc6   :  { %786 = vperm.xlu0 %2336, %v2654_v18  }
  0xc8   :  { %v2753_v41 = vpop.permute.xlu1 %149  ;;  %2323 = vset.pattern.permute.xlu1 %v2500_v26  ;;  %v2756_v42 = vpop.permute.xlu0 %141 }
  0xc9   :  { %931 = vperm.xlu1 %2323, %v2654_v18  }
  0xca   :  { %2340 = vset.pattern.permute.xlu0 %v2506_v43 }
  0xcb   :  { %489 = vperm.xlu0 %2340, %v2643_v13  }
  0xcc   :  { %v2761_v44 = vpop.permute.xlu0 %153 }
  0xcd   :  { %935 = vperm.xlu1 %2323, %v2695_v29   ;;  %v345_v45 = vpop.permute.xlu1 %344 }
  0xce   :  { %v359_v58 = vadd.f32 %v2782_v53, %v345_v45 }
  0xcf   :  { %501 = vperm.xlu0 %2340, %v2645_v15  }
  0xd0   :  { %v2765_v46 = vpop.permute.xlu0 %666 }
  0xd1   :  { %2325 = vset.pattern.permute.xlu1 %v2503_v32  ;;  %v353_v47 = vpop.permute.xlu1 %352 }
  0xd2   :  { %228 = vperm.xlu1 %2325, %v2643_v13   ;;  %v361_v61 = vadd.f32 %v2786_v55, %v353_v47 }
  0xd3   :  { %1014 = vperm.xlu0 %2340, %v2656_v19  }
  0xd4   :  { %v2770_v48 = vpop.permute.xlu0 %678 }
  0xd5   :  { %v357_v50 = vpop.permute.xlu1 %356 }
  0xd6   :  { %236 = vperm.xlu1 %2325, %v2641_v12   ;;  %v362_v56 = vadd.f32 %v2779_v52, %v357_v50 }
  0xd7   :  { %1026 = vperm.xlu0 %2340, %v2666_v23  }
  0xd8   :  { %v364_v1 = vmax.f32 %v361_v61, %v362_v56  ;;  %v2509_v61 = vmov 7  }
  0xd9   :  { %v349_v57 = vpop.permute.xlu0 %348 }
  0xda   :  { %v360_v59 = vadd.f32 %v2784_v54, %v349_v57  ;;  %240 = vperm.xlu1 %2325, %v2645_v15   ;;  %v378_v60 = vpop.permute.xlu1 %377 }
  0xdb   :  { %2342 = vset.pattern.permute.xlu0 %v2507_v62  ;;  %v389_v14 = vadd.f32 %v2784_v54, %v378_v60 }
  0xdc   :  { %v363_v63 = vmax.f32 %v359_v58, %v360_v59  ;;  %290 = vperm.xlu0 %2342, %v2652_v17  }
  0xdd   :  { %v2795_v2 = vpop.permute.xlu0 %873 }
  0xde   :  { %2326 = vset.pattern.permute.xlu1 %v2504_v33  ;;  %v382_v3 = vpop.permute.xlu1 %381  ;;  %v365_v4 = vmax.f32 %v363_v63, %v364_v1 }
  0xdf   :  { %464 = vperm.xlu1 %2326, %v2652_v17   ;;  %v390_v16 = vadd.f32 %v2786_v55, %v382_v3 }
  0xe0   :  { %815 = vperm.xlu0 %2342, %v2654_v18   ;;  %v366_v6 = vrot.slane %v365_v4, 4 }
  0xe2   :  { %v374_v5 = vpop.permute.xlu0 %373  ;;  %v367_v11 = vmax.f32 %v365_v4, %v366_v6 }
  0xe3   :  { %468 = vperm.xlu1 %2326, %v2641_v12   ;;  %v2801_v7 = vpop.permute.xlu1 %170  ;;  %v388_v9 = vadd.f32 %v2782_v53, %v374_v5 }
  0xe4   :  { %2346 = vset.pattern.permute.xlu0 %v2508_v8  ;;  %v368_v26 = vrot.slane %v367_v11, 2 }
  0xe5   :  { %518 = vperm.xlu0 %2346, %v2643_v13   ;;  %v392_v22 = vmax.f32 %v388_v9, %v389_v14  ;;  %v2510_v9 = vmov 15  }
  0xe6   :  { %v386_v10 = vpop.permute.xlu0 %385  ;;  %v369_v47 = vmax.f32 %v367_v11, %v368_v26 }
  0xe7   :  { %v391_v20 = vadd.f32 %v2779_v52, %v386_v10  ;;  %2327 = vset.pattern.permute.xlu1 %v2501_v30  ;;  %v2810_v21 = vpop.permute.xlu1 %178 }
  0xe8   :  { %724 = vperm.xlu1 %2327, %v2656_v19   ;;  %v370_v56 = vrot.slane %v369_v47, 1 }
  0xe9   :  { %v393_v24 = vmax.f32 %v390_v16, %v391_v20  ;;  %530 = vperm.xlu0 %2346, %v2645_v15  }
  0xea   :  { %v2814_v25 = vpop.permute.xlu0 %898  ;;  %v371_v63 = vmax.f32 %v369_v47, %v370_v56 }
  0xeb   :  { %v394_v27 = vmax.f32 %v392_v22, %v393_v24  ;;  %v2816_v28 = vpop.permute.xlu1 %182 }
  0xec   :  { %732 = vperm.xlu1 %2327, %v2695_v29  }
  0xed   :  { %v395_v45 = vrot.slane %v394_v27, 4  ;;  %1043 = vperm.xlu0 %2346, %v2656_v19  }
  0xee   :  { %v2820_v30 = vpop.permute.xlu0 %910 }
  0xef   :  { %v396_v49 = vmax.f32 %v394_v27, %v395_v45  ;;  %v2105_v27 = vld [vmem:[%s3355_s0 + $0x10] sm:$0xff]   ;;  %v2106_v45 = vld [vmem:[%s3355_s0 + $0x18] sm:$0xff]  }
  0xf0   :  { %736 = vperm.xlu1 %2327, %v2666_v23   ;;  %v407_v50 = vpop.permute.xlu1 %406  ;;  %v2862_v56 = vunpack.c.h.bf16 %v2106_v45 }
  0xf1   :  { %v397_v51 = vrot.slane %v396_v49, 2  ;;  %1055 = vperm.xlu0 %2346, %v2666_v23   ;;  %v418_v14 = vadd.f32 %v2784_v54, %v407_v50  ;;  %v2858_v50 = vunpack.c.h.bf16 %v2105_v27 }
  0xf3   :  { %v398_v57 = vmax.f32 %v396_v49, %v397_v51  ;;  %v2824_v58 = vpop.permute.xlu0 %174  ;;  %v2860_v51 = vunpack.c.l.bf16 %v2105_v27 }
  0xf4   :  { %2329 = vset.pattern.permute.xlu1 %v2502_v31  ;;  %v411_v59 = vpop.permute.xlu1 %410 }
  0xf5   :  { %v399_v60 = vrot.slane %v398_v57, 1  ;;  %960 = vperm.xlu1 %2329, %v2654_v18   ;;  %2348 = vset.pattern.permute.xlu0 %v2509_v61  ;;  %v419_v16 = vadd.f32 %v2786_v55, %v411_v59  ;;  %v2865_v59 = vunpack.c.l.bf16 %v2106_v45 }
  0xf6   :  { %319 = vperm.xlu0 %2348, %v2652_v17  }
  0xf7   :  { %v400_v1 = vmax.f32 %v398_v57, %v399_v60  ;;  %v2830_v3 = vpop.permute.xlu0 %699  ;;  %v681_v60 = vadd.f32 %v2860_v51, %v2765_v46  ;;  %v84_v46 = vld [vmem:[%s3358_s3 + $0x8] sm:$0xff] }
  0xf9   :  { %v589_v4 = vsel %vm575_vm0, %v371_v63, %v400_v1  ;;  %964 = vperm.xlu1 %2329, %v2695_v29   ;;  %v2834_v5 = vpop.permute.xlu1 %634  ;;  %v684_v63 = vadd.f32 %v2862_v56, %v2770_v48 }
  0xfa   :  { %844 = vperm.xlu0 %2348, %v2654_v18  }
  0xfc   :  { %v403_v31 = vpop.permute.xlu0 %402 }
  0xfd   :  { %2331 = vset.pattern.permute.xlu1 %v2505_v38  ;;  %v2838_v6 = vpop.permute.xlu1 %644  ;;  %v417_v10 = vadd.f32 %v2782_v53, %v403_v31 }
  0xfe   :  { %257 = vperm.xlu1 %2331, %v2643_v13   ;;  %2350 = vset.pattern.permute.xlu0 %v2510_v9 }
  0xff   :  { %547 = vperm.xlu0 %2350, %v2643_v13   ;;  %v421_v24 = vmax.f32 %v417_v10, %v418_v14 }
 0x100   :  { %v415_v11 = vpop.permute.xlu0 %414 }
 0x101   :  { %v420_v20 = vadd.f32 %v2779_v52, %v415_v11  ;;  %v2847_v22 = vpop.permute.xlu1 %649 }
 0x102   :  { %265 = vperm.xlu1 %2331, %v2641_v12  }
 0x103   :  { %v422_v26 = vmax.f32 %v419_v16, %v420_v20  ;;  %559 = vperm.xlu0 %2350, %v2645_v15  }
 0x105   :  { %v423_v47 = vmax.f32 %v421_v24, %v422_v26 }
 0x106   :  { %269 = vperm.xlu1 %2331, %v2645_v15   ;;  %v671_v49 = vpop.permute.xlu1 %670 }
 0x107   :  { %v424_v57 = vrot.slane %v423_v47, 4  ;;  %1072 = vperm.xlu0 %2350, %v2656_v19   ;;  %v682_v31 = vadd.f32 %v2858_v50, %v671_v49 }
 0x109   :  { %v425_v1 = vmax.f32 %v423_v47, %v424_v57  ;;  %v685_v20 = vmax.f32 %v681_v60, %v682_v31  ;;  %v885_v57 = vadd.f32 %v2858_v50, %v2795_v2 }
 0x10a   :  { %2332 = vset.pattern.permute.xlu1 %v2506_v43  ;;  %v675_v10 = vpop.permute.xlu1 %674 }
 0x10b   :  { %v426_v11 = vrot.slane %v425_v1, 2  ;;  %v683_v14 = vadd.f32 %v2865_v59, %v675_v10  ;;  %493 = vperm.xlu1 %2332, %v2652_v17   ;;  %1084 = vperm.xlu0 %2350, %v2666_v23  }
 0x10d   :  { %v427_v16 = vmax.f32 %v425_v1, %v426_v11  ;;  %v686_v24 = vmax.f32 %v683_v14, %v684_v63  ;;  %v2891_v63 = vpop.permute.xlu0 %927  ;;  %v127_v14 = vadd.f32 %v2782_v53, %v2736_v35 }
 0x10f   :  { %v428_v48 = vrot.slane %v427_v16, 1  ;;  %v2879_v26 = vmax.f32 %v685_v20, %v686_v24  ;;  %497 = vperm.xlu1 %2332, %v2641_v12   ;;  %v870_v27 = vpop.permute.xlu1 %869  ;;  %2353 = vset.pattern.permute.xlu0 %v2495_v0  ;;  %v186_v20 = vadd.f32 %v2784_v54, %v2824_v58  ;;  %v128_v24 = vadd.f32 %v2784_v54, %v2742_v37 }
 0x110   :  { %603 = vperm.xlu0 %2353, %v84_v46   ;;  %v884_v60 = vadd.f32 %v2860_v51, %v870_v27  ;;  %v158_v46 = vadd.f32 %v2786_v55, %v2753_v41  ;;  %v129_v58 = vadd.f32 %v2786_v55, %v2733_v34  ;;  %v185_v37 = vadd.f32 %v2782_v53, %v2801_v7 }
 0x111   :  { %v429_v45 = vmax.f32 %v427_v16, %v428_v48  ;;  %v130_v16 = vadd.f32 %v2779_v52, %v2740_v36  ;;  %v2914_v35 = vpop.permute.xlu0 %939  ;;  %v1842_v36 = vld [vmem:[%s3357_s2 + $0x10] sm:$0xff]  ;;  %v188_v41 = vadd.f32 %v2779_v52, %v2816_v28  ;;  %v916_v34 = vadd.f32 %v2862_v56, %v2820_v30 }
 0x112   :  { %v888_v2 = vmax.f32 %v884_v60, %v885_v57  ;;  %v913_v60 = vadd.f32 %v2860_v51, %v2814_v25  ;;  %v131_v28 = vmax.f32 %v127_v14, %v128_v24 }
 0x113   :  { %2333 = vset.pattern.permute.xlu1 %v2503_v32  ;;  %v878_v47 = vpop.permute.xlu1 %877  ;;  %v2885_v49 = vsel %vm577_vm1, %v589_v4, %v429_v45  ;;  %v1840_v32 = vld [vmem:[%s3357_s2] sm:$0xff]  ;;  %v159_v4 = vadd.f32 %v2779_v52, %v2761_v44  ;;  %v156_v44 = vadd.f32 %v2782_v53, %v2756_v42  ;;  %v157_v42 = vadd.f32 %v2784_v54, %v2749_v40 }
 0x114   :  { %753 = vperm.xlu1 %2333, %v2656_v19   ;;  %v886_v31 = vadd.f32 %v2865_v59, %v878_v47  ;;  %1846 = vperm.xlu0 %2353, %v1840_v32   ;;  %v187_v47 = vadd.f32 %v2786_v55, %v2810_v21  ;;  %v2068_v21 = vld [vmem:[%s3357_s2 + $0x20] sm:$0xff] }
 0x115   :  { %v161_v45 = vmax.f32 %v158_v46, %v159_v4 }
 0x116   :  { %v190_v32 = vmax.f32 %v187_v47, %v188_v41 }
 0x117   :  { %v882_v1 = vpop.permute.xlu1 %881 }
 0x118   :  { %v887_v10 = vadd.f32 %v2862_v56, %v882_v1  ;;  %761 = vperm.xlu1 %2333, %v2695_v29   ;;  %1856 = vperm.xlu0 %2353, %v1842_v36   ;;  %v189_v1 = vmax.f32 %v185_v37, %v186_v20 }
 0x11a   :  { %v889_v11 = vmax.f32 %v886_v31, %v887_v10  ;;  %v132_v31 = vmax.f32 %v129_v58, %v130_v16  ;;  %v160_v10 = vmax.f32 %v156_v44, %v157_v42 }
 0x11c   :  { %v890_v48 = vmax.f32 %v888_v2, %v889_v11  ;;  %765 = vperm.xlu1 %2333, %v2666_v23   ;;  %v903_v27 = vpop.permute.xlu1 %902  ;;  %1953 = vperm.xlu0 %2353, %v2068_v21   ;;  %v162_v30 = vmax.f32 %v160_v10, %v161_v45  ;;  %v204_v2 = vpop.permute.xlu0 %203  ;;  %v191_v11 = vmax.f32 %v189_v1, %v190_v32 }
 0x11d   :  { %v914_v7 = vadd.f32 %v2858_v50, %v903_v27  ;;  %v133_v20 = vmax.f32 %v131_v28, %v132_v31 }
 0x11e   :  { %v891_v57 = vrot.slane %v890_v48, 4  ;;  %v192_v36 = vrot.slane %v191_v11, 4 }
 0x11f   :  { %v917_v16 = vmax.f32 %v913_v60, %v914_v7  ;;  %v134_v37 = vrot.slane %v133_v20, 4  ;;  %v215_v7 = vadd.f32 %v2784_v54, %v204_v2 }
 0x120   :  { %2335 = vset.pattern.permute.xlu1 %v2504_v33  ;;  %v907_v40 = vpop.permute.xlu1 %906  ;;  %v892_v4 = vmax.f32 %v890_v48, %v891_v57  ;;  %v2070_v33 = vld [vmem:[%s3357_s2 + $0x30] sm:$0xff]  ;;  %v163_v48 = vrot.slane %v162_v30, 4  ;;  %v2944_v27 = vpop.permute.xlu0 %728  ;;  %v193_v57 = vmax.f32 %v191_v11, %v192_v36  ;;  %v655_v36 = vadd.f32 %v2862_v56, %v2847_v22 }
 0x121   :  { %v915_v25 = vadd.f32 %v2865_v59, %v907_v40  ;;  %989 = vperm.xlu1 %2335, %v2654_v18   ;;  %1963 = vperm.xlu0 %2353, %v2070_v33  }
 0x122   :  { %v893_v24 = vrot.slane %v892_v4, 2  ;;  %v164_v47 = vmax.f32 %v162_v30, %v163_v48 }
 0x123   :  { %v918_v14 = vmax.f32 %v915_v25, %v916_v34  ;;  %v135_v34 = vmax.f32 %v133_v20, %v134_v37  ;;  %v194_v25 = vrot.slane %v193_v57, 2 }
 0x124   :  { %v894_v41 = vmax.f32 %v892_v4, %v893_v24  ;;  %v432_v31 = vpop.permute.xlu0 %431  ;;  %v165_v21 = vrot.slane %v164_v47, 2 }
 0x125   :  { %v919_v46 = vmax.f32 %v917_v16, %v918_v14  ;;  %993 = vperm.xlu1 %2335, %v2695_v29   ;;  %v200_v44 = vpop.permute.xlu1 %199  ;;  %v136_v11 = vrot.slane %v135_v34, 2  ;;  %v195_v48 = vmax.f32 %v193_v57, %v194_v25  ;;  %v446_v57 = vadd.f32 %v2782_v53, %v432_v31 }
 0x126   :  { %v214_v1 = vadd.f32 %v2782_v53, %v200_v44  ;;  %v895_v28 = vrot.slane %v894_v41, 1  ;;  %v166_v24 = vmax.f32 %v164_v47, %v165_v21  ;;  %v654_v47 = vadd.f32 %v2865_v59, %v2838_v6 }
 0x127   :  { %v920_v58 = vrot.slane %v919_v46, 4  ;;  %v137_v37 = vmax.f32 %v135_v34, %v136_v11 }
 0x128   :  { %v218_v16 = vmax.f32 %v214_v1, %v215_v7  ;;  %v896_v20 = vmax.f32 %v894_v41, %v895_v28  ;;  %v444_v44 = vpop.permute.xlu0 %443  ;;  %v652_v41 = vadd.f32 %v2860_v51, %v2834_v5  ;;  %v167_v1 = vrot.slane %v166_v24, 1 }
 0x129   :  { %v921_v42 = vmax.f32 %v919_v46, %v920_v58  ;;  %2337 = vset.pattern.permute.xlu1 %v2507_v62  ;;  %v208_v45 = vpop.permute.xlu1 %207  ;;  %v449_v22 = vadd.f32 %v2779_v52, %v444_v44  ;;  %v196_v28 = vrot.slane %v195_v48, 1  ;;  %v138_v5 = vrot.slane %v137_v37, 1 }
 0x12a   :  { %286 = vperm.xlu1 %2337, %v2643_v13   ;;  %v216_v32 = vadd.f32 %v2786_v55, %v208_v45 }
 0x12b   :  { %v922_v60 = vrot.slane %v921_v42, 2  ;;  %v197_v25 = vmax.f32 %v195_v48, %v196_v28 }
 0x12d   :  { %v923_v10 = vmax.f32 %v921_v42, %v922_v60  ;;  %v212_v40 = vpop.permute.xlu1 %211  ;;  %v653_v42 = vadd.f32 %v2858_v50, %v2747_v39  ;;  %v657_v39 = vmax.f32 %v654_v47, %v655_v36  ;;  %v711_v47 = vadd.f32 %v2858_v50, %v2830_v3 }
 0x12e   :  { %v217_v4 = vadd.f32 %v2779_v52, %v212_v40  ;;  %294 = vperm.xlu1 %2337, %v2641_v12  }
 0x12f   :  { %v924_v30 = vrot.slane %v923_v10, 1  ;;  %v656_v6 = vmax.f32 %v652_v41, %v653_v42 }
 0x130   :  { %v219_v14 = vmax.f32 %v216_v32, %v217_v4  ;;  %v168_v4 = vmax.f32 %v166_v24, %v167_v1 }
 0x131   :  { %v925_v33 = vmax.f32 %v923_v10, %v924_v30  ;;  %v658_v30 = vmax.f32 %v656_v6, %v657_v39 }
 0x132   :  { %v220_v2 = vmax.f32 %v218_v16, %v219_v14  ;;  %298 = vperm.xlu1 %2337, %v2645_v15   ;;  %v436_v46 = vpop.permute.xlu1 %435  ;;  %v139_v14 = vmax.f32 %v137_v37, %v138_v5 }
 0x133   :  { %v2957_v58 = vsel %vm575_vm0, %v896_v20, %v925_v33  ;;  %v447_v60 = vadd.f32 %v2784_v54, %v436_v46  ;;  %v688_v33 = vrot.slane %v2879_v26, 4  ;;  %v659_v36 = vrot.slane %v658_v30, 4 }
 0x134   :  { %v221_v45 = vrot.slane %v220_v2, 4  ;;  %v576_v44 = vsel %vm575_vm0, %v139_v14, %v168_v4 }
 0x135   :  { %v450_v21 = vmax.f32 %v446_v57, %v447_v60  ;;  %v578_v48 = vsel %vm577_vm1, %v576_v44, %v197_v25  ;;  %v689_v37 = vmax.f32 %v2879_v26, %v688_v33  ;;  %v2984_v57 = vpop.permute.xlu0 %956 }
 0x136   :  { %v222_v7 = vmax.f32 %v220_v2, %v221_v45  ;;  %2338 = vset.pattern.permute.xlu1 %v2508_v8  ;;  %v440_v34 = vpop.permute.xlu1 %439 }
 0x137   :  { %v448_v10 = vadd.f32 %v2786_v55, %v440_v34  ;;  %522 = vperm.xlu1 %2338, %v2652_v17   ;;  %v690_v28 = vrot.slane %v689_v37, 2 }
 0x138   :  { %v223_v40 = vrot.slane %v222_v7, 2 }
 0x139   :  { %v451_v32 = vmax.f32 %v448_v10, %v449_v22  ;;  %v660_v22 = vmax.f32 %v658_v30, %v659_v36  ;;  %v942_v30 = vadd.f32 %v2860_v51, %v2891_v63 }
 0x13a   :  { %v224_v31 = vmax.f32 %v222_v7, %v223_v40 }
 0x13b   :  { %v452_v11 = vmax.f32 %v450_v21, %v451_v32  ;;  %526 = vperm.xlu1 %2338, %v2641_v12   ;;  %v696_v16 = vpop.permute.xlu1 %695  ;;  %v661_v5 = vrot.slane %v660_v22, 2  ;;  %v2990_v21 = vpop.permute.xlu0 %968  ;;  %v691_v32 = vmax.f32 %v689_v37, %v690_v28 }
 0x13c   :  { %v225_v20 = vrot.slane %v224_v31, 1  ;;  %v710_v60 = vadd.f32 %v2860_v51, %v696_v16 }
 0x13d   :  { %v453_v2 = vrot.slane %v452_v11, 4  ;;  %v662_v25 = vmax.f32 %v660_v22, %v661_v5  ;;  %v692_v33 = vrot.slane %v691_v32, 1 }
 0x13e   :  { %v226_v46 = vmax.f32 %v224_v31, %v225_v20  ;;  %v714_v26 = vmax.f32 %v710_v60, %v711_v47 }
 0x13f   :  { %v454_v42 = vmax.f32 %v452_v11, %v453_v2  ;;  %2339 = vset.pattern.permute.xlu1 %v2505_v38  ;;  %v704_v24 = vpop.permute.xlu1 %703  ;;  %v945_v11 = vadd.f32 %v2862_v56, %v2914_v35  ;;  %v663_v44 = vrot.slane %v662_v25, 1 }
 0x140   :  { %782 = vperm.xlu1 %2339, %v2656_v19   ;;  %v2978_v41 = vsel %vm579_vm2, %v578_v48, %v226_v46  ;;  %v712_v7 = vadd.f32 %v2865_v59, %v704_v24  ;;  %v233_v46 = vpop.permute.xlu0 %232  ;;  %v693_v24 = vmax.f32 %v691_v32, %v692_v33 }
 0x141   :  { %v455_v45 = vrot.slane %v454_v42, 2 }
 0x143   :  { %v456_v38 = vmax.f32 %v454_v42, %v455_v45  ;;  %v708_v1 = vpop.permute.xlu1 %707 }
 0x144   :  { %v713_v34 = vadd.f32 %v2862_v56, %v708_v1  ;;  %790 = vperm.xlu1 %2339, %v2695_v29   ;;  %v3005_v45 = vpop.permute.xlu0 %757 }
 0x145   :  { %v457_v39 = vrot.slane %v456_v38, 1 }
 0x146   :  { %v715_v10 = vmax.f32 %v712_v7, %v713_v34 }
 0x147   :  { %v458_v40 = vmax.f32 %v456_v38, %v457_v39  ;;  %v244_v39 = vadd.f32 %v2784_v54, %v233_v46 }
 0x148   :  { %v716_v3 = vmax.f32 %v714_v26, %v715_v10  ;;  %794 = vperm.xlu1 %2339, %v2666_v23   ;;  %v932_v6 = vpop.permute.xlu1 %931  ;;  %v461_v26 = vpop.permute.xlu0 %460 }
 0x149   :  { %v2994_v4 = vsel %vm579_vm2, %v2885_v49, %v458_v40  ;;  %v943_v16 = vadd.f32 %v2858_v50, %v932_v6 }
 0x14a   :  { %v717_v31 = vrot.slane %v716_v3, 4 }
 0x14b   :  { %v946_v36 = vmax.f32 %v942_v30, %v943_v16 }
 0x14c   :  { %v718_v14 = vmax.f32 %v716_v3, %v717_v31  ;;  %2341 = vset.pattern.permute.xlu1 %v2506_v43  ;;  %v936_v20 = vpop.permute.xlu1 %935  ;;  %v664_v43 = vmax.f32 %v662_v25, %v663_v44  ;;  %v475_v25 = vadd.f32 %v2782_v53, %v461_v26  ;;  %v473_v16 = vpop.permute.xlu0 %472 }
 0x14d   :  { %v944_v2 = vadd.f32 %v2865_v59, %v936_v20  ;;  %1018 = vperm.xlu1 %2341, %v2654_v18  }
 0x14e   :  { %v719_v49 = vrot.slane %v718_v14, 2  ;;  %v1100_v1 = vsel %vm575_vm0, %v664_v43, %v693_v24 }
 0x14f   :  { %v947_v42 = vmax.f32 %v944_v2, %v945_v11 }
 0x150   :  { %v720_v63 = vmax.f32 %v718_v14, %v719_v49  ;;  %v478_v49 = vadd.f32 %v2779_v52, %v473_v16 }
 0x151   :  { %v948_v48 = vmax.f32 %v946_v36, %v947_v42  ;;  %1022 = vperm.xlu1 %2341, %v2695_v29   ;;  %v229_v35 = vpop.permute.xlu1 %228 }
 0x152   :  { %v721_v37 = vrot.slane %v720_v63, 1  ;;  %v243_v28 = vadd.f32 %v2782_v53, %v229_v35 }
 0x153   :  { %v949_v47 = vrot.slane %v948_v48, 4 }
 0x154   :  { %v722_v60 = vmax.f32 %v720_v63, %v721_v37  ;;  %v247_v32 = vmax.f32 %v243_v28, %v244_v39  ;;  %v740_v63 = vadd.f32 %v2858_v50, %v2944_v27 }
 0x155   :  { %v950_v22 = vmax.f32 %v948_v48, %v949_v47  ;;  %2343 = vset.pattern.permute.xlu1 %v2509_v61  ;;  %v237_v38 = vpop.permute.xlu1 %236 }
 0x156   :  { %315 = vperm.xlu1 %2343, %v2643_v13   ;;  %v3011_v7 = vsel %vm577_vm1, %v1100_v1, %v722_v60  ;;  %v245_v40 = vadd.f32 %v2786_v55, %v237_v38 }
 0x157   :  { %v951_v34 = vrot.slane %v950_v22, 2 }
 0x159   :  { %v952_v10 = vmax.f32 %v950_v22, %v951_v34  ;;  %v241_v5 = vpop.permute.xlu1 %240 }
 0x15a   :  { %v246_v3 = vadd.f32 %v2779_v52, %v241_v5  ;;  %323 = vperm.xlu1 %2343, %v2641_v12  }
 0x15b   :  { %v953_v6 = vrot.slane %v952_v10, 1 }
 0x15c   :  { %v248_v13 = vmax.f32 %v245_v40, %v246_v3 }
 0x15d   :  { %v954_v31 = vmax.f32 %v952_v10, %v953_v6  ;;  %v971_v10 = vadd.f32 %v2860_v51, %v2984_v57 }
 0x15e   :  { %v249_v30 = vmax.f32 %v247_v32, %v248_v13  ;;  %327 = vperm.xlu1 %2343, %v2645_v15   ;;  %v465_v11 = vpop.permute.xlu1 %464 }
 0x15f   :  { %v476_v14 = vadd.f32 %v2784_v54, %v465_v11  ;;  %v3023_v20 = vsel %vm577_vm1, %v2957_v58, %v954_v31  ;;  %v974_v31 = vadd.f32 %v2862_v56, %v2990_v21 }
 0x160   :  { %v250_v33 = vrot.slane %v249_v30, 4 }
 0x161   :  { %v479_v2 = vmax.f32 %v475_v25, %v476_v14 }
 0x162   :  { %v251_v46 = vmax.f32 %v249_v30, %v250_v33  ;;  %2344 = vset.pattern.permute.xlu1 %v2510_v9  ;;  %v469_v44 = vpop.permute.xlu1 %468 }
 0x163   :  { %v477_v36 = vadd.f32 %v2786_v55, %v469_v44  ;;  %551 = vperm.xlu1 %2344, %v2652_v17  }
 0x164   :  { %v252_v15 = vrot.slane %v251_v46, 2 }
 0x165   :  { %v480_v42 = vmax.f32 %v477_v36, %v478_v49 }
 0x166   :  { %v253_v24 = vmax.f32 %v251_v46, %v252_v15 }
 0x167   :  { %v481_v58 = vmax.f32 %v479_v2, %v480_v42  ;;  %555 = vperm.xlu1 %2344, %v2641_v12   ;;  %v725_v48 = vpop.permute.xlu1 %724  ;;  %v3039_v12 = vpop.permute.xlu0 %985 }
 0x168   :  { %v254_v35 = vrot.slane %v253_v24, 1  ;;  %v739_v37 = vadd.f32 %v2860_v51, %v725_v48 }
 0x169   :  { %v482_v43 = vrot.slane %v481_v58, 4 }
 0x16a   :  { %v255_v47 = vmax.f32 %v253_v24, %v254_v35  ;;  %v743_v60 = vmax.f32 %v739_v37, %v740_v63 }
 0x16b   :  { %v483_v22 = vmax.f32 %v481_v58, %v482_v43  ;;  %2345 = vset.pattern.permute.xlu1 %v2507_v62  ;;  %v733_v17 = vpop.permute.xlu1 %732  ;;  %v3047_v3 = vpop.permute.xlu0 %997 }
 0x16c   :  { %811 = vperm.xlu1 %2345, %v2656_v19   ;;  %v3037_v27 = vsel %vm581_vm3, %v2978_v41, %v255_v47  ;;  %v741_v28 = vadd.f32 %v2865_v59, %v733_v17 }
 0x16d   :  { %v484_v38 = vrot.slane %v483_v22, 2 }
 0x16f   :  { %v485_v1 = vmax.f32 %v483_v22, %v484_v38  ;;  %v737_v34 = vpop.permute.xlu1 %736  ;;  %v262_v14 = vpop.permute.xlu0 %261  ;;  %v2354_v22 = vld [vmem:[#allocation12] sm:$0xff]  }
 0x170   :  { %v742_v39 = vadd.f32 %v2862_v56, %v737_v34  ;;  %819 = vperm.xlu1 %2345, %v2695_v29   ;;  %v273_v58 = vadd.f32 %v2784_v54, %v262_v14  ;;  %2164 = vmatprep.subr.bf16.mxu0 %v2354_v22  ;;  %v83_v14 = vld [vmem:[%s3358_s3] sm:$0xff] }
 0x171   :  { %v486_v26 = vrot.slane %v485_v1, 1  ;;  %2165 = vmatpush3.bf16.msra.mxu0 %v2354_v22  ;;  %v1841_v22 = vld [vmem:[%s3357_s2 + $0x8] sm:$0xff] }
 0x172   :  { %v744_v62 = vmax.f32 %v741_v28, %v742_v39  ;;  %v2355_v39 = vld [vmem:[#allocation12 + $0x8] sm:$0xff]  }
 0x173   :  { %v487_v5 = vmax.f32 %v485_v1, %v486_v26  ;;  %v3060_v44 = vpop.permute.xlu0 %786  ;;  %2166 = vmatprep.subr.bf16.mxu0 %v2355_v39 }
 0x174   :  { %v745_v40 = vmax.f32 %v743_v60, %v744_v62  ;;  %823 = vperm.xlu1 %2345, %v2666_v23   ;;  %v961_v41 = vpop.permute.xlu1 %960 }
 0x175   :  { %v972_v6 = vadd.f32 %v2858_v50, %v961_v41  ;;  %v3052_v32 = vsel %vm581_vm3, %v2994_v4, %v487_v5  ;;  %2167 = vmatpush3.bf16.msra.mxu0 %v2355_v39  ;;  %v2356_v41 = vld [vmem:[#allocation12 + $0x10] sm:$0xff]   ;;  %v2361_v39 = vld [vmem:[#allocation12 + $0x38] sm:$0xff]  }
 0x176   :  { %v746_v13 = vrot.slane %v745_v40, 4  ;;  %2168 = vmatprep.subr.bf16.mxu0 %v2356_v41 }
 0x177   :  { %v975_v25 = vmax.f32 %v971_v10, %v972_v6  ;;  %v490_v48 = vpop.permute.xlu0 %489 }
 0x178   :  { %v747_v30 = vmax.f32 %v745_v40, %v746_v13  ;;  %2347 = vset.pattern.permute.xlu1 %v2508_v8  ;;  %v965_v57 = vpop.permute.xlu1 %964  ;;  %v504_v62 = vadd.f32 %v2782_v53, %v490_v48 }
 0x179   :  { %v973_v11 = vadd.f32 %v2865_v59, %v965_v57  ;;  %1047 = vperm.xlu1 %2347, %v2654_v18   ;;  %2169 = vmatpush3.bf16.msra.mxu0 %v2356_v41 }
 0x17a   :  { %v748_v16 = vrot.slane %v747_v30, 2 }
 0x17b   :  { %v976_v33 = vmax.f32 %v973_v11, %v974_v31  ;;  %v502_v1 = vpop.permute.xlu0 %501  ;;  %v769_v31 = vadd.f32 %v2858_v50, %v3005_v45 }
 0x17c   :  { %v749_v2 = vmax.f32 %v747_v30, %v748_v16  ;;  %v507_v10 = vadd.f32 %v2779_v52, %v502_v1  ;;  %v2357_v16 = vld [vmem:[#allocation12 + $0x18] sm:$0xff]  }
 0x17d   :  { %v977_v49 = vmax.f32 %v975_v25, %v976_v33  ;;  %1051 = vperm.xlu1 %2347, %v2695_v29   ;;  %v258_v4 = vpop.permute.xlu1 %257  ;;  %2170 = vmatprep.subr.bf16.mxu0 %v2357_v16 }
 0x17e   :  { %v750_v46 = vrot.slane %v749_v2, 1  ;;  %v272_v24 = vadd.f32 %v2782_v53, %v258_v4  ;;  %2171 = vmatpush3.bf16.msra.mxu0 %v2357_v16  ;;  %v2358_v4 = vld [vmem:[#allocation12 + $0x20] sm:$0xff]  }
 0x17f   :  { %v978_v21 = vrot.slane %v977_v49, 4  ;;  %2172 = vmatprep.subr.bf16.mxu0 %v2358_v4 }
 0x180   :  { %v751_v36 = vmax.f32 %v749_v2, %v750_v46 }
 0x181   :  { %v979_v15 = vmax.f32 %v977_v49, %v978_v21  ;;  %2349 = vset.pattern.permute.xlu1 %v2509_v61  ;;  %v266_v8 = vpop.permute.xlu1 %265  ;;  %v85_v21 = vld [vmem:[%s3358_s3 + $0x10] sm:$0xff] }
 0x182   :  { %840 = vperm.xlu1 %2349, %v2656_v19   ;;  %v3066_v42 = vsel %vm579_vm2, %v3011_v7, %v751_v36  ;;  %v274_v43 = vadd.f32 %v2786_v55, %v266_v8  ;;  %v276_v19 = vmax.f32 %v272_v24, %v273_v58  ;;  %v3099_v36 = vpop.permute.xlu0 %1014  ;;  %2173 = vmatpush3.bf16.msra.mxu0 %v2358_v4  ;;  %v2359_v24 = vld [vmem:[#allocation12 + $0x28] sm:$0xff]   ;;  %v86_v58 = vld [vmem:[%s3358_s3 + $0x18] sm:$0xff] }
 0x183   :  { %v980_v63 = vrot.slane %v979_v15, 2  ;;  %2174 = vmatprep.subr.bf16.mxu0 %v2359_v24 }
 0x185   :  { %v981_v35 = vmax.f32 %v979_v15, %v980_v63  ;;  %v270_v37 = vpop.permute.xlu1 %269 }
 0x186   :  { %v275_v47 = vadd.f32 %v2779_v52, %v270_v37  ;;  %848 = vperm.xlu1 %2349, %v2695_v29   ;;  %2175 = vmatpush3.bf16.msra.mxu0 %v2359_v24 }
 0x187   :  { %v982_v61 = vrot.slane %v981_v35, 1 }
 0x188   :  { %v277_v60 = vmax.f32 %v274_v43, %v275_v47 }
 0x189   :  { %v983_v7 = vmax.f32 %v981_v35, %v982_v61  ;;  %v1000_v35 = vadd.f32 %v2860_v51, %v3039_v12  ;;  %v3108_v61 = vpop.permute.xlu0 %1026  ;;  %v1003_v12 = vadd.f32 %v2862_v56, %v3047_v3 }
 0x18a   :  { %v278_v17 = vmax.f32 %v276_v19, %v277_v60  ;;  %852 = vperm.xlu1 %2349, %v2666_v23   ;;  %v494_v38 = vpop.permute.xlu1 %493  ;;  %v2360_v19 = vld [vmem:[#allocation12 + $0x30] sm:$0xff]  }
 0x18b   :  { %v3076_v34 = vsel %vm579_vm2, %v3023_v20, %v983_v7  ;;  %v505_v26 = vadd.f32 %v2784_v54, %v494_v38  ;;  %2176 = vmatprep.subr.bf16.mxu0 %v2360_v19 }
 0x18c   :  { %v279_v28 = vrot.slane %v278_v17, 4  ;;  %2177 = vmatpush3.bf16.msra.mxu0 %v2360_v19 }
 0x18d   :  { %v508_v6 = vmax.f32 %v504_v62, %v505_v26  ;;  %v1843_v62 = vld [vmem:[%s3357_s2 + $0x18] sm:$0xff]  ;;  %2178 = vmatprep.subr.bf16.mxu0 %v2361_v39 }
 0x18e   :  { %v280_v5 = vmax.f32 %v278_v17, %v279_v28  ;;  %2351 = vset.pattern.permute.xlu1 %v2510_v9  ;;  %v498_v23 = vpop.permute.xlu1 %497 }
 0x18f   :  { %v506_v40 = vadd.f32 %v2786_v55, %v498_v23  ;;  %1076 = vperm.xlu1 %2351, %v2654_v18  }
 0x190   :  { %v281_v20 = vrot.slane %v280_v5, 2  ;;  %2179 = vmatpush3.bf16.msra.mxu0 %v2361_v39 }
 0x191   :  { %v509_v13 = vmax.f32 %v506_v40, %v507_v10 }
 0x192   :  { %v282_v25 = vmax.f32 %v280_v5, %v281_v20  ;;  %v2069_v20 = vld [vmem:[%s3357_s2 + $0x28] sm:$0xff] }
 0x193   :  { %v510_v30 = vmax.f32 %v508_v6, %v509_v13  ;;  %1080 = vperm.xlu1 %2351, %v2695_v29   ;;  %v754_v9 = vpop.permute.xlu1 %753 }
 0x194   :  { %v283_v57 = vrot.slane %v282_v25, 1  ;;  %v768_v11 = vadd.f32 %v2860_v51, %v754_v9  ;;  %v2071_v9 = vld [vmem:[%s3357_s2 + $0x38] sm:$0xff] }
 0x195   :  { %v511_v18 = vrot.slane %v510_v30, 4 }
 0x196   :  { %v284_v33 = vmax.f32 %v282_v25, %v283_v57  ;;  %v772_v2 = vmax.f32 %v768_v11, %v769_v31 }
 0x197   :  { %v512_v45 = vmax.f32 %v510_v30, %v511_v18  ;;  %2352 = vset.pattern.permute.xlu1 %v2495_v0  ;;  %v762_v49 = vpop.permute.xlu1 %761 }
 0x198   :  { %598 = vperm.xlu1 %2352, %v83_v14   ;;  %v3094_v29 = vsel %vm583_vm4, %v3037_v27, %v284_v33  ;;  %v770_v0 = vadd.f32 %v2865_v59, %v762_v49 }
 0x199   :  { %v513_v46 = vrot.slane %v512_v45, 2 }
 0x19b   :  { %v514_v15 = vmax.f32 %v512_v45, %v513_v46  ;;  %v766_v8 = vpop.permute.xlu1 %765 }
 0x19c   :  { %v771_v63 = vadd.f32 %v2862_v56, %v766_v8  ;;  %1116 = vperm.xlu1 %2352, %v85_v21  }
 0x19d   :  { %v515_v27 = vrot.slane %v514_v15, 1 }
 0x19e   :  { %v773_v48 = vmax.f32 %v770_v0, %v771_v63 }
 0x19f   :  { %v516_v37 = vmax.f32 %v514_v15, %v515_v27 }
 0x1a0   :  { %v774_v43 = vmax.f32 %v772_v2, %v773_v48  ;;  %v990_v47 = vpop.permute.xlu1 %989  ;;  %1121 = vperm.xlu1 %2352, %v86_v58  }
 0x1a1   :  { %v1001_v60 = vadd.f32 %v2858_v50, %v990_v47  ;;  %v3116_v7 = vsel %vm583_vm4, %v3052_v32, %v516_v37  ;;  %v291_v32 = vpop.permute.xlu0 %290 }
 0x1a2   :  { %v775_v17 = vrot.slane %v774_v43, 4  ;;  %v302_v18 = vadd.f32 %v2784_v54, %v291_v32 }
 0x1a3   :  { %v1004_v38 = vmax.f32 %v1000_v35, %v1001_v60 }
 0x1a4   :  { %v776_v1 = vmax.f32 %v774_v43, %v775_v17  ;;  %v994_v28 = vpop.permute.xlu1 %993  ;;  %1851 = vperm.xlu1 %2352, %v1841_v22   ;;  %v798_v22 = vadd.f32 %v2858_v50, %v3060_v44 }
 0x1a5   :  { %v1002_v26 = vadd.f32 %v2865_v59, %v994_v28  ;;  %v3127_v6 = vpop.permute.xlu0 %815 }
 0x1a6   :  { %v777_v10 = vrot.slane %v776_v1, 2 }
 0x1a7   :  { %v1005_v5 = vmax.f32 %v1002_v26, %v1003_v12 }
 0x1a8   :  { %v778_v23 = vmax.f32 %v776_v1, %v777_v10  ;;  %1861 = vperm.xlu1 %2352, %v1843_v62  }
 0x1a9   :  { %v1006_v3 = vmax.f32 %v1004_v38, %v1005_v5  ;;  %v287_v40 = vpop.permute.xlu1 %286  ;;  %v519_v14 = vpop.permute.xlu0 %518 }
 0x1aa   :  { %v779_v41 = vrot.slane %v778_v23, 1  ;;  %v301_v16 = vadd.f32 %v2782_v53, %v287_v40  ;;  %v533_v58 = vadd.f32 %v2782_v53, %v519_v14 }
 0x1ab   :  { %v1007_v13 = vrot.slane %v1006_v3, 4 }
 0x1ac   :  { %v780_v31 = vmax.f32 %v778_v23, %v779_v41  ;;  %1958 = vperm.xlu1 %2352, %v2069_v20   ;;  %v305_v46 = vmax.f32 %v301_v16, %v302_v18 }
 0x1ad   :  { %v1008_v25 = vmax.f32 %v1006_v3, %v1007_v13  ;;  %v295_v30 = vpop.permute.xlu1 %294  ;;  %v531_v0 = vpop.permute.xlu0 %530 }
 0x1ae   :  { %v3134_v57 = vsel %vm581_vm3, %v3066_v42, %v780_v31  ;;  %v303_v45 = vadd.f32 %v2786_v55, %v295_v30  ;;  %v536_v48 = vadd.f32 %v2779_v52, %v531_v0 }
 0x1af   :  { %v1009_v11 = vrot.slane %v1008_v25, 2 }
 0x1b0   :  { %1968 = vperm.xlu1 %2352, %v2071_v9  }
 0x1b1   :  { %v1010_v33 = vmax.f32 %v1008_v25, %v1009_v11  ;;  %v299_v2 = vpop.permute.xlu1 %298  ;;  %v1044_v18 = vpop.permute.xlu0 %1043 }
 0x1b2   :  { %v304_v49 = vadd.f32 %v2779_v52, %v299_v2 }
 0x1b3   :  { %v1011_v4 = vrot.slane %v1010_v33, 1 }
 0x1b4   :  { %v306_v21 = vmax.f32 %v303_v45, %v304_v49 }
 0x1b5   :  { %v1012_v15 = vmax.f32 %v1010_v33, %v1011_v4  ;;  %v1056_v49 = vpop.permute.xlu0 %1055 }
 0x1b6   :  { %v307_v8 = vmax.f32 %v305_v46, %v306_v21  ;;  %v523_v42 = vpop.permute.xlu1 %522 }
 0x1b7   :  { %v3142_v63 = vsel %vm581_vm3, %v3076_v34, %v1012_v15  ;;  %v534_v27 = vadd.f32 %v2784_v54, %v523_v42 }
 0x1b8   :  { %v308_v24 = vrot.slane %v307_v8, 4 }
 0x1b9   :  { %v537_v19 = vmax.f32 %v533_v58, %v534_v27  ;;  %v320_v15 = vpop.permute.xlu0 %319 }
 0x1ba   :  { %v309_v35 = vmax.f32 %v307_v8, %v308_v24  ;;  %v527_v37 = vpop.permute.xlu1 %526 }
 0x1bb   :  { %v535_v43 = vadd.f32 %v2786_v55, %v527_v37 }
 0x1bc   :  { %v310_v47 = vrot.slane %v309_v35, 2 }
 0x1bd   :  { %v538_v60 = vmax.f32 %v535_v43, %v536_v48  ;;  %v845_v8 = vpop.permute.xlu0 %844 }
 0x1be   :  { %v311_v17 = vmax.f32 %v309_v35, %v310_v47 }
 0x1bf   :  { %v539_v34 = vmax.f32 %v537_v19, %v538_v60  ;;  %v783_v12 = vpop.permute.xlu1 %782  ;;  %v331_v60 = vadd.f32 %v2784_v54, %v320_v15 }
 0x1c0   :  { %v312_v38 = vrot.slane %v311_v17, 1  ;;  %v797_v1 = vadd.f32 %v2860_v51, %v783_v12 }
 0x1c1   :  { %v540_v28 = vrot.slane %v539_v34, 4  ;;  %v548_v0 = vpop.permute.xlu0 %547 }
 0x1c2   :  { %v801_v39 = vmax.f32 %v797_v1, %v798_v22  ;;  %v313_v26 = vmax.f32 %v311_v17, %v312_v38 }
 0x1c3   :  { %v541_v62 = vmax.f32 %v539_v34, %v540_v28  ;;  %v791_v10 = vpop.permute.xlu1 %790 }
 0x1c4   :  { %v3153_v32 = vsel %vm585_vm5, %v3094_v29, %v313_v26  ;;  %v799_v44 = vadd.f32 %v2865_v59, %v791_v10  ;;  %v1032_v10 = vadd.f32 %v2862_v56, %v3108_v61  ;;  %v1061_v61 = vadd.f32 %v2862_v56, %v1056_v49 }
 0x1c5   :  { %v542_v5 = vrot.slane %v541_v62, 2  ;;  %v560_v27 = vpop.permute.xlu0 %559 }
 0x1c6   :  { %v565_v35 = vadd.f32 %v2779_v52, %v560_v27 }
 0x1c7   :  { %v543_v23 = vmax.f32 %v541_v62, %v542_v5  ;;  %v795_v3 = vpop.permute.xlu1 %794 }
 0x1c8   :  { %v800_v40 = vadd.f32 %v2862_v56, %v795_v3  ;;  %v1029_v3 = vadd.f32 %v2860_v51, %v3099_v36 }
 0x1c9   :  { %v544_v20 = vrot.slane %v543_v23, 1 }
 0x1ca   :  { %v802_v41 = vmax.f32 %v799_v44, %v800_v40 }
 0x1cb   :  { %v545_v13 = vmax.f32 %v543_v23, %v544_v20 }
 0x1cc   :  { %v803_v31 = vmax.f32 %v801_v39, %v802_v41  ;;  %v1019_v25 = vpop.permute.xlu1 %1018  ;;  %v827_v41 = vadd.f32 %v2858_v50, %v3127_v6 }
 0x1cd   :  { %v3159_v30 = vsel %vm585_vm5, %v3116_v7, %v545_v13  ;;  %v1030_v44 = vadd.f32 %v2858_v50, %v1019_v25 }
 0x1ce   :  { %v804_v9 = vrot.slane %v803_v31, 4 }
 0x1d0   :  { %v805_v11 = vmax.f32 %v803_v31, %v804_v9  ;;  %v1023_v29 = vpop.permute.xlu1 %1022 }
 0x1d2   :  { %v806_v16 = vrot.slane %v805_v11, 2 }
 0x1d4   :  { %v807_v14 = vmax.f32 %v805_v11, %v806_v16 }
 0x1d5   :  { %v316_v33 = vpop.permute.xlu1 %315 }
 0x1d6   :  { %v808_v2 = vrot.slane %v807_v14, 1  ;;  %v330_v19 = vadd.f32 %v2782_v53, %v316_v33  ;;  %v1033_v33 = vmax.f32 %v1029_v3, %v1030_v44 }
 0x1d8   :  { %v809_v45 = vmax.f32 %v807_v14, %v808_v2  ;;  %v334_v1 = vmax.f32 %v330_v19, %v331_v60 }
 0x1d9   :  { %v324_v4 = vpop.permute.xlu1 %323 }
 0x1da   :  { %v3163_v46 = vsel %vm583_vm4, %v3134_v57, %v809_v45  ;;  %v562_v57 = vadd.f32 %v2782_v53, %v548_v0  ;;  %v332_v22 = vadd.f32 %v2786_v55, %v324_v4  ;;  %v1031_v53 = vadd.f32 %v2865_v59, %v1023_v29 }
 0x1db   :  { %v1058_v29 = vadd.f32 %v2860_v51, %v1044_v18  ;;  %v856_v0 = vadd.f32 %v2858_v50, %v845_v8 }
 0x1dc   :  { %v1034_v9 = vmax.f32 %v1031_v53, %v1032_v10 }
 0x1dd   :  { %v328_v21 = vpop.permute.xlu1 %327 }
 0x1de   :  { %v333_v37 = vadd.f32 %v2779_v52, %v328_v21  ;;  %v1035_v4 = vmax.f32 %v1033_v33, %v1034_v9 }
 0x1e0   :  { %v335_v34 = vmax.f32 %v332_v22, %v333_v37 }
 0x1e2   :  { %v552_v7 = vpop.permute.xlu1 %551  ;;  %v336_v39 = vmax.f32 %v334_v1, %v335_v34 }
 0x1e3   :  { %v563_v43 = vadd.f32 %v2784_v54, %v552_v7  ;;  %v1073_v7 = vpop.permute.xlu0 %1072 }
 0x1e4   :  { %v337_v5 = vrot.slane %v336_v39, 4 }
 0x1e5   :  { %v566_v12 = vmax.f32 %v562_v57, %v563_v43 }
 0x1e6   :  { %v556_v42 = vpop.permute.xlu1 %555  ;;  %v338_v11 = vmax.f32 %v336_v39, %v337_v5 }
 0x1e7   :  { %v564_v48 = vadd.f32 %v2786_v55, %v556_v42 }
 0x1e8   :  { %v339_v21 = vrot.slane %v338_v11, 2 }
 0x1e9   :  { %v567_v17 = vmax.f32 %v564_v48, %v565_v35 }
 0x1ea   :  { %v340_v48 = vmax.f32 %v338_v11, %v339_v21 }
 0x1eb   :  { %v812_v24 = vpop.permute.xlu1 %811  ;;  %v568_v28 = vmax.f32 %v566_v12, %v567_v17  ;;  %v1085_v17 = vpop.permute.xlu0 %1084 }
 0x1ec   :  { %v826_v54 = vadd.f32 %v2860_v51, %v812_v24  ;;  %v341_v34 = vrot.slane %v340_v48, 1  ;;  %v1090_v10 = vadd.f32 %v2862_v56, %v1085_v17 }
 0x1ed   :  { %v569_v52 = vrot.slane %v568_v28, 4 }
 0x1ee   :  { %v830_v16 = vmax.f32 %v826_v54, %v827_v41  ;;  %v342_v5 = vmax.f32 %v340_v48, %v341_v34 }
 0x1ef   :  { %v820_v58 = vpop.permute.xlu1 %819  ;;  %v570_v40 = vmax.f32 %v568_v28, %v569_v52  ;;  %v1087_v28 = vadd.f32 %v2860_v51, %v1073_v7  ;;  %v3198_v3 = vpop.permute.xlu0 %603 }
 0x1f0   :  { %v828_v55 = vadd.f32 %v2865_v59, %v820_v58  ;;  %v1036_v58 = vrot.slane %v1035_v4, 4 }
 0x1f1   :  { %v571_v36 = vrot.slane %v570_v40, 2 }
 0x1f2   :  { %v1037_v22 = vmax.f32 %v1035_v4, %v1036_v58 }
 0x1f3   :  { %v824_v47 = vpop.permute.xlu1 %823  ;;  %v572_v49 = vmax.f32 %v570_v40, %v571_v36 }
 0x1f4   :  { %v829_v62 = vadd.f32 %v2862_v56, %v824_v47 }
 0x1f5   :  { %v573_v57 = vrot.slane %v572_v49, 1 }
 0x1f6   :  { %v831_v13 = vmax.f32 %v828_v55, %v829_v62  ;;  %v1038_v62 = vrot.slane %v1037_v22, 2 }
 0x1f7   :  { %v574_v8 = vmax.f32 %v572_v49, %v573_v57  ;;  %v2372_v57 = vld [vmem:[%s3363_s8 + $0x50] sm:$0xff]  }
 0x1f8   :  { %v1048_v38 = vpop.permute.xlu1 %1047  ;;  %v832_v25 = vmax.f32 %v830_v16, %v831_v13  ;;  %v1039_v40 = vmax.f32 %v1037_v22, %v1038_v62  ;;  %v2018_v22 = vld [vmem:[%s3362_s7] ss:$0 sm:$0xff] }
 0x1f9   :  { %v1059_v31 = vadd.f32 %v2858_v50, %v1048_v38 }
 0x1fa   :  { %v833_v24 = vrot.slane %v832_v25, 4 }
 0x1fb   :  { %v1062_v45 = vmax.f32 %v1058_v29, %v1059_v31  ;;  %v1040_v29 = vrot.slane %v1039_v40, 1 }
 0x1fc   :  { %v1052_v26 = vpop.permute.xlu1 %1051  ;;  %v834_v47 = vmax.f32 %v832_v25, %v833_v24 }
 0x1fd   :  { %v1060_v23 = vadd.f32 %v2865_v59, %v1052_v26  ;;  %v1041_v25 = vmax.f32 %v1039_v40, %v1040_v29  ;;  %v1332_v40 = vld [vmem:[#allocation10 + $0x10] sm:$0xff]  ;;  %v2375_v29 = vld [vmem:[%s3363_s8 + $0x88] sm:$0xff]  }
 0x1fe   :  { %v835_v39 = vrot.slane %v834_v47, 2 }
 0x1ff   :  { %v1063_v14 = vmax.f32 %v1060_v23, %v1061_v61  ;;  %v595_v23 = vsel %vm587_vm6, %v3159_v30, %v574_v8 }
 0x201   :  { %v841_v20 = vpop.permute.xlu1 %840  ;;  %v1064_v15 = vmax.f32 %v1062_v45, %v1063_v14 }
 0x202   :  { %v855_v6 = vadd.f32 %v2860_v51, %v841_v20  ;;  %v836_v51 = vmax.f32 %v834_v47, %v835_v39  ;;  %v2374_v47 = vld [vmem:[%s3363_s8 + $0x58] sm:$0xff]  }
 0x203   :  { %v1065_v35 = vrot.slane %v1064_v15, 4 }
 0x204   :  { %v859_v37 = vmax.f32 %v855_v6, %v856_v0  ;;  %v837_v30 = vrot.slane %v836_v51, 1 }
 0x205   :  { %v849_v2 = vpop.permute.xlu1 %848  ;;  %v1066_v12 = vmax.f32 %v1064_v15, %v1065_v35  ;;  %v1258_v35 = vld [vmem:[#allocation7] sm:$0xff] }
 0x206   :  { %v857_v18 = vadd.f32 %v2865_v59, %v849_v2  ;;  %v838_v2 = vmax.f32 %v836_v51, %v837_v30  ;;  %v2369_v30 = vld [vmem:[%s3363_s8 + $0x38] sm:$0xff]  }
 0x207   :  { %v1067_v54 = vrot.slane %v1066_v12, 2 }
 0x208   :  { %v1105_v6 = vsel %vm585_vm5, %v3163_v46, %v838_v2  ;;  %v2370_v46 = vld [vmem:[%s3363_s8 + $0x40] sm:$0xff]   ;;  %v2382_v2 = vld [vmem:[%s3363_s8 + $0x78] sm:$0xff]  }
 0x209   :  { %v853_v42 = vpop.permute.xlu1 %852  ;;  %v1068_v13 = vmax.f32 %v1066_v12, %v1067_v54  ;;  %2200 = vmatprep.subr.bf16.mxu0 %v2370_v46  ;;  %v1260_v54 = vld [vmem:[#allocation7 + $0x10] sm:$0xff] }
 0x20a   :  { %v858_v27 = vadd.f32 %v2862_v56, %v853_v42  ;;  %v588_v56 = vsel %vm587_vm6, %v3153_v32, %v342_v5  ;;  %v1111_v42 = vsel %vm583_vm4, %v3142_v63, %v1041_v25  ;;  %v2371_v63 = vld [vmem:[%s3363_s8 + $0x48] sm:$0xff]  }
 0x20b   :  { %v1069_v33 = vrot.slane %v1068_v13, 1  ;;  %v2383_v25 = vld [vmem:[%s3363_s8 + $0xa8] sm:$0xff]  }
 0x20c   :  { %v860_v43 = vmax.f32 %v857_v18, %v858_v27 }
 0x20d   :  { %v1070_v21 = vmax.f32 %v1068_v13, %v1069_v33  ;;  %v2366_v13 = vld [vmem:[%s3363_s8 + $0x20] sm:$0xff]   ;;  %v2380_v33 = vld [vmem:[%s3363_s8 + $0x70] sm:$0xff]  }
 0x20e   :  { %v861_v19 = vmax.f32 %v859_v37, %v860_v43  ;;  %v1077_v60 = vpop.permute.xlu1 %1076  ;;  %v1259_v37 = vld [vmem:[#allocation7 + $0x8] sm:$0xff] }
 0x20f   :  { %v1088_v1 = vadd.f32 %v2858_v50, %v1077_v60  ;;  %v1112_v0 = vsel %vm585_vm5, %v1111_v42, %v1070_v21  ;;  %v1262_v43 = vpack.c.bf16 %v1259_v37, %v1258_v35  ;;  %v2378_v60 = vld [vmem:[%s3363_s8 + $0x68] sm:$0xff]  }
 0x210   :  { %v862_v38 = vrot.slane %v861_v19, 4 }
 0x211   :  { %v1091_v50 = vmax.f32 %v1087_v28, %v1088_v1  ;;  %2188 = vmatprep.mubr.msk.bf16.mxu1 %vm1270_vm7, %v1262_v43 }
 0x212   :  { %v863_v26 = vmax.f32 %v861_v19, %v862_v38  ;;  %v1081_v52 = vpop.permute.xlu1 %1080  ;;  %v2376_v19 = vld [vmem:[%s3363_s8 + $0x60] sm:$0xff]  }
 0x213   :  { %v1089_v53 = vadd.f32 %v2865_v59, %v1081_v52  ;;  %v607_v59 = vmul.f32 %v3198_v3, %v595_v23  ;;  %v1330_v23 = vld [vmem:[#allocation10] sm:$0xff] }
 0x214   :  { %v864_v55 = vrot.slane %v863_v26, 2 }
 0x215   :  { %v1092_v44 = vmax.f32 %v1089_v53, %v1090_v10 }
 0x216   :  { %v865_v20 = vmax.f32 %v863_v26, %v864_v55  ;;  %v1261_v55 = vld [vmem:[#allocation7 + $0x18] sm:$0xff] }
 0x217   :  { %v1093_v41 = vmax.f32 %v1091_v50, %v1092_v44  ;;  %v3202_v61 = vpop.permute.xlu1 %598  ;;  %v1331_v50 = vld [vmem:[#allocation10 + $0x8] sm:$0xff]  ;;  %v1263_v44 = vpack.c.bf16 %v1261_v55, %v1260_v54 }
 0x218   :  { %v606_v31 = vmul.f32 %v3202_v61, %v588_v56  ;;  %v866_v14 = vrot.slane %v865_v20, 1  ;;  %v1334_v51 = vpack.c.bf16 %v1331_v50, %v1330_v23  ;;  %v2363_v56 = vld [vmem:[%s3363_s8 + $0x8] sm:$0xff]  }
 0x219   :  { %v1094_v9 = vrot.slane %v1093_v41, 4 }
 0x21a   :  { %v608_v11 = vpack.c.bf16 %v607_v59, %v606_v31  ;;  %v867_v32 = vmax.f32 %v865_v20, %v866_v14  ;;  %v2362_v20 = vld [vmem:[%s3363_s8] sm:$0xff]   ;;  %v2365_v59 = vld [vmem:[%s3363_s8 + $0x18] sm:$0xff]   ;;  %v2367_v31 = vld [vmem:[%s3363_s8 + $0x28] sm:$0xff]  }
 0x21b   :  { %v1095_v16 = vmax.f32 %v1093_v41, %v1094_v9  ;;  %v1117_v4 = vpop.permute.xlu1 %1116  ;;  %v2368_v9 = vld [vmem:[%s3363_s8 + $0x30] sm:$0xff]   ;;  %v2379_v14 = vld [vmem:[%s3363_s8 + $0x98] sm:$0xff]  }
 0x21c   :  { %2180 = vmatprep.mubr.bf16.mxu0 %v608_v11  ;;  %v1106_v49 = vsel %vm587_vm6, %v1105_v6, %v867_v32  ;;  %v2373_v11 = vld [vmem:[%s3363_s8 + $0x80] sm:$0xff]   ;;  %v2385_v32 = vld [vmem:[%s3363_s8 + $0xb8] sm:$0xff]  }
 0x21d   :  { %v1096_v36 = vrot.slane %v1095_v16, 2  ;;  %v1124_v27 = vmul.f32 %v1117_v4, %v1106_v49 }
 0x21f   :  { %v1097_v45 = vmax.f32 %v1095_v16, %v1096_v36  ;;  %v1122_v18 = vpop.permute.xlu1 %1121  ;;  %v2377_v16 = vld [vmem:[%s3363_s8 + $0x90] sm:$0xff]   ;;  %v2381_v36 = vld [vmem:[%s3363_s8 + $0xa0] sm:$0xff]  }
 0x221   :  { %v1098_v15 = vrot.slane %v1097_v45, 1 }
 0x223   :  { %v1099_v7 = vmax.f32 %v1097_v45, %v1098_v15  ;;  %v2384_v45 = vld [vmem:[%s3363_s8 + $0xb0] sm:$0xff]   ;;  %v81_v15 = vld [vmem:[%s3365_s10] sm:$0x3] }
 0x224   :  { %v82_v6 = vmul.f32 1e-08, %v81_v15 }
 0x225   :  { %v1113_v24 = vsel %vm587_vm6, %v1112_v0, %v1099_v7 }
 0x226   :  { %v1125_v58 = vmul.f32 %v1122_v18, %v1113_v24 }
 0x228   :  { %v1126_v48 = vpack.c.bf16 %v1125_v58, %v1124_v27 }
 0x22a   :  { %2181 = vmatmul.mubr.bf16.vlgmr.msra.gmra.mrb[0].mxu0 %v1126_v48 }
 0x22b   :  { %2201 = vmatpush3.bf16.msra.mxu0 %v2370_v46 }
 0x22c   :  { %2202 = vmatprep.subr.bf16.mxu0 %v2371_v63 }
 0x22f   :  { %2203 = vmatpush3.bf16.msra.mxu0 %v2371_v63 }
 0x230   :  { %2204 = vmatprep.subr.bf16.mxu0 %v2372_v57 }
 0x233   :  { %2205 = vmatpush3.bf16.msra.mxu0 %v2372_v57 }
 0x234   :  { %2206 = vmatprep.subr.bf16.mxu0 %v2374_v47 }
 0x237   :  { %2207 = vmatpush3.bf16.msra.mxu0 %v2374_v47 }
 0x238   :  { %2208 = vmatprep.subr.bf16.mxu0 %v2376_v19 }
 0x23b   :  { %2209 = vmatpush3.bf16.msra.mxu0 %v2376_v19 }
 0x23c   :  { %2210 = vmatprep.subr.bf16.mxu0 %v2378_v60 }
 0x23f   :  { %2211 = vmatpush3.bf16.msra.mxu0 %v2378_v60 }
 0x240   :  { %2212 = vmatprep.subr.bf16.mxu0 %v2380_v33 }
 0x243   :  { %2213 = vmatpush3.bf16.msra.mxu0 %v2380_v33 }
 0x244   :  { %2214 = vmatprep.subr.bf16.mxu0 %v2382_v2 }
 0x247   :  { %2215 = vmatpush3.bf16.msra.mxu0 %v2382_v2  ;;  %v2060_v2 = vld [vmem:[%s3356_s1 + $0x30] sm:$0xff] }
 0x2fd   :  { %v2182_v17 = vpop.f32.mrb[0].mxu0 }
 0x2fe   :  { %v1244_v34 = vadd.f32 %v2182_v17, %v2018_v22  ;;  %v1235_v12 = vpop.f32.mrb[1].mxu0 }
 0x2ff   :  { %v1236_v38 = vadd.f32 %v2018_v22, %v1235_v12  ;;  %v2183_v8 = vpop.f32.mrb[2].mxu0 }
 0x300   :  { %v1247_v1 = vadd.f32 %v2183_v8, %v2018_v22  ;;  %v1238_v28 = vpop.f32.mrb[3].mxu0  ;;  %v1252_v26 = vmul.f32 %v1244_v34, %v1117_v4  ;;  %v1266_v4 = vlaneseq }
 0x301   :  { %v1239_v39 = vadd.f32 %v2018_v22, %v1238_v28  ;;  %v1250_v62 = vmul.f32 %v1236_v38, %v3202_v61  ;;  %v2364_v61 = vld [vmem:[%s3363_s8 + $0x10] sm:$0xff]   ;;  %v1770_v28 = vld [vmem:[%s3356_s1 + $0x8] sm:$0xff] }
 0x302   :  { %v1253_v52 = vmul.f32 %v1247_v1, %v1122_v18  ;;  %v1267_v21 = vshrl.u32 %v1266_v4, 7  ;;  %v1769_v1 = vld [vmem:[%s3356_s1] sm:$0xff]  ;;  %v1852_v4 = vpop.permute.xlu1 %1851 }
 0x303   :  { %v1251_v10 = vmul.f32 %v1239_v39, %v3198_v3  ;;  %v1333_v3 = vld [vmem:[#allocation10 + $0x18] sm:$0xff]  ;;  %v1773_v39 = vpack.c.bf16 %v1770_v28, %v1769_v1 }
 0x304   :  { %v1255_v53 = vpack.c.bf16 %v1253_v52, %v1252_v26  ;;  %v1335_v41 = vpack.c.bf16 %v1333_v3, %v1332_v40  ;;  %v1268_v49 = vsub.s32 1, %v1267_v21  ;;  %v1340_v48 = vsub.s32 0, %v1267_v21  ;;  %v2107_v21 = vld [vmem:[%s3355_s0 + $0x8] sm:$0xff]  }
 0x305   :  { %v1254_v5 = vpack.c.bf16 %v1251_v10, %v1250_v62 }
 0x306   :  { %v1269_v7 = vrot.slane %v82_v6, %v1268_v49  ;;  %v1341_v63 = vrot.slane %v82_v6, %v1340_v48  ;;  %v2089_v6 = vld [vmem:[%s3355_s0] sm:$0xff]   ;;  %v1862_v49 = vpop.permute.xlu1 %1861  ;;  %v2109_v48 = vld [vmem:[%s3355_s0 + $0x18] sm:$0xff]  }
 0x307   :  { %2184 = vmatprep.subr.bf16.mxu1 %v1254_v5  ;;  %v2103_v1 = vunpack.c.h.bf16 %v2109_v48 }
 0x308   :  { %2185 = vmatpush3.bf16.msra.mxu1 %v1254_v5 }
 0x309   :  { %2186 = vmatprep.subr.bf16.mxu1 %v1255_v53 }
 0x30c   :  { %2187 = vmatpush3.bf16.msra.mxu1 %v1255_v53 }
 0x30d   :  { %2192 = vmatprep.subr.bf16.mxu1 %v1254_v5 }
 0x30f   :  { %2189 = vmatmul.mubr.msk.bf16.vlgmr.msra.gmra.mrb[0].mxu1 %vm1270_vm7, %v1263_v44 }
 0x310   :  { %2193 = vmatpush3.bf16.msra.mxu1 %v1254_v5  ;;  %2196 = vmatprep.mubr.msk.bf16.mxu1 %vm1270_vm7, %v1334_v51 }
 0x311   :  { %2194 = vmatprep.subr.bf16.mxu1 %v1255_v53 }
 0x314   :  { %2195 = vmatpush3.bf16.msra.mxu1 %v1255_v53 }
 0x315   :  { %2220 = vmatprep.subr.bf16.mxu1 %v2362_v20 }
 0x317   :  { %2197 = vmatmul.mubr.msk.bf16.vlgmr.msra.gmra.mrb[4].mxu1 %vm1270_vm7, %v1335_v41 }
 0x318   :  { %2221 = vmatpush3.bf16.msra.mxu1 %v2362_v20  ;;  %2236 = vmatprep.mubr.bf16.mxu1 %v1254_v5  ;;  %v2055_v5 = vld [vmem:[%s3364_s9] ss:$0 sm:$0xff] }
 0x319   :  { %2222 = vmatprep.subr.bf16.mxu1 %v2363_v56 }
 0x31c   :  { %2223 = vmatpush3.bf16.msra.mxu1 %v2363_v56 }
 0x31d   :  { %2224 = vmatprep.subr.bf16.mxu1 %v2364_v61 }
 0x320   :  { %2225 = vmatpush3.bf16.msra.mxu1 %v2364_v61 }
 0x321   :  { %2226 = vmatprep.subr.bf16.mxu1 %v2365_v59 }
 0x324   :  { %2227 = vmatpush3.bf16.msra.mxu1 %v2365_v59 }
 0x325   :  { %2228 = vmatprep.subr.bf16.mxu1 %v2366_v13 }
 0x328   :  { %2229 = vmatpush3.bf16.msra.mxu1 %v2366_v13 }
 0x329   :  { %2230 = vmatprep.subr.bf16.mxu1 %v2367_v31 }
 0x32c   :  { %2231 = vmatpush3.bf16.msra.mxu1 %v2367_v31 }
 0x32d   :  { %2232 = vmatprep.subr.bf16.mxu1 %v2368_v9 }
 0x330   :  { %2233 = vmatpush3.bf16.msra.mxu1 %v2368_v9 }
 0x331   :  { %2234 = vmatprep.subr.bf16.mxu1 %v2369_v30 }
 0x334   :  { %2235 = vmatpush3.bf16.msra.mxu1 %v2369_v30  ;;  %v1771_v30 = vld [vmem:[%s3356_s1 + $0x10] sm:$0xff] }
 0x335   :  { %2240 = vmatprep.subr.bf16.mxu1 %v2373_v11 }
 0x337   :  { %2237 = vmatmul.mubr.bf16.vlgmr.msra.gmra.mrb[8].mxu1 %v1255_v53 }
 0x338   :  { %2241 = vmatpush3.bf16.msra.mxu1 %v2373_v11  ;;  %v1772_v11 = vld [vmem:[%s3356_s1 + $0x18] sm:$0xff] }
 0x339   :  { %2242 = vmatprep.subr.bf16.mxu1 %v2375_v29  ;;  %v1774_v33 = vpack.c.bf16 %v1772_v11, %v1771_v30 }
 0x33c   :  { %2243 = vmatpush3.bf16.msra.mxu1 %v2375_v29 }
 0x33d   :  { %2244 = vmatprep.subr.bf16.mxu1 %v2377_v16 }
 0x340   :  { %2245 = vmatpush3.bf16.msra.mxu1 %v2377_v16  ;;  %v2058_v16 = vld [vmem:[%s3356_s1 + $0x20] sm:$0xff] }
 0x341   :  { %2246 = vmatprep.subr.bf16.mxu1 %v2379_v14 }
 0x344   :  { %2247 = vmatpush3.bf16.msra.mxu1 %v2379_v14  ;;  %v2059_v14 = vld [vmem:[%s3356_s1 + $0x28] sm:$0xff] }
 0x345   :  { %2248 = vmatprep.subr.bf16.mxu1 %v2381_v36 }
 0x348   :  { %2249 = vmatpush3.bf16.msra.mxu1 %v2381_v36  ;;  %v1880_v36 = vpack.c.bf16 %v2059_v14, %v2058_v16 }
 0x349   :  { %2250 = vmatprep.subr.bf16.mxu1 %v2383_v25 }
 0x34c   :  { %2251 = vmatpush3.bf16.msra.mxu1 %v2383_v25  ;;  %v2061_v25 = vld [vmem:[%s3356_s1 + $0x38] sm:$0xff] }
 0x34d   :  { %2252 = vmatprep.subr.bf16.mxu1 %v2384_v45 }
 0x350   :  { %2253 = vmatpush3.bf16.msra.mxu1 %v2384_v45  ;;  %v1881_v45 = vpack.c.bf16 %v2061_v25, %v2060_v2 }
 0x351   :  { %2254 = vmatprep.subr.bf16.mxu1 %v2385_v32 }
 0x354   :  { %2255 = vmatpush3.bf16.msra.mxu1 %v2385_v32  ;;  %v1847_v32 = vpop.permute.xlu0 %1846 }
 0x358   :  { %v1857_v15 = vpop.permute.xlu0 %1856 }
 0x3e2   :  { %v2190_v42 = vpop.f32.mrb[0].mxu1 }
 0x3e3   :  { %v1311_v0 = vpop.f32.mrb[1].mxu1  ;;  %v1320_v18 = vadd.f32 %v2190_v42, %v1269_v7  ;;  %v2090_v42 = vunpack.c.l.bf16 %v2089_v6 }
 0x3e4   :  { %v2191_v24 = vpop.f32.mrb[2].mxu1  ;;  %v1312_v35 = vadd.f32 %v1311_v0, %v1269_v7  ;;  %v2095_v0 = vunpack.c.h.bf16 %v2107_v21 }
 0x3e5   :  { %v1323_v27 = vadd.f32 %v2191_v24, %v1269_v7  ;;  %v1314_v58 = vpop.f32.mrb[3].mxu1  ;;  %v1954_v24 = vpop.permute.xlu0 %1953 }
 0x3e6   :  { %v1315_v37 = vadd.f32 %v1314_v58, %v1269_v7  ;;  %v2094_v7 = vunpack.c.l.bf16 %v2107_v21  ;;  %v1864_v58 = vmul.f32 %v2090_v42, %v1847_v32 }
 0x3e7   :  { %v1327_v43 = vpack.c.bf16 %v1323_v27, %v1320_v18  ;;  %v2091_v18 = vunpack.c.h.bf16 %v2089_v6 }
 0x3e8   :  { %v1326_v46 = vpack.c.bf16 %v1315_v37, %v1312_v35  ;;  %v1866_v27 = vmul.f32 %v2094_v7, %v1857_v15  ;;  %v1959_v35 = vpop.permute.xlu1 %1958 }
 0x3ea   :  { %v2198_v57 = vpop.f32.mrb[4].mxu1  ;;  %2216 = vmatprep.mubr.bf16.mxu0 %v1326_v46  ;;  %v1867_v46 = vmul.f32 %v2095_v0, %v1862_v49 }
 0x3eb   :  { %v1382_v47 = vpop.f32.mrb[5].mxu1  ;;  %2217 = vmatmul.mubr.bf16.vlgmr.msra.gmra.mrb[4].mxu0 %v1327_v43  ;;  %v1391_v60 = vadd.f32 %v2198_v57, %v1341_v63  ;;  %v2108_v43 = vld [vmem:[%s3355_s0 + $0x10] sm:$0xff]   ;;  %s2511_s0 = smov [#allocation13]  }
 0x3ec   :  { %v2199_v19 = vpop.f32.mrb[6].mxu1  ;;  %v1383_v34 = vadd.f32 %v1382_v47, %v1341_v63  ;;  %2262 = vmatprep.mubr.msk.bf16.mxu0 %vm1776_vm8, %v1773_v39  ;;  %v1865_v47 = vmul.f32 %v2091_v18, %v1852_v4  ;;  %v2099_v28 = vunpack.c.h.bf16 %v2108_v43  ;;  %v1969_v39 = vpop.permute.xlu1 %1968  ;;  %s1989_s12 = sshll.u32 %s2511_s0, 4  ;;  %s1990_s12 = int_to_ptr.vmem [resolvable:$true] %s1989_s12 }
 0x3ed   :  { %v1394_v22 = vadd.f32 %v2199_v19, %v1341_v63  ;;  %v1385_v17 = vpop.f32.mrb[7].mxu1  ;;  %s2460_s8 = scalar_lea.vmem %s1990_s12, 1024  ;;  %p2465_p11 = scmp.lt.s32.totalorder %s1990_s12, %s1990_s12 }
 0x3ee   :  { %v1386_v12 = vadd.f32 %v1385_v17, %v1341_v63  ;;  %p2461_p10 = scmp.ne.s32.totalorder %s1990_s12, %s2460_s8  ;;  %p2466_p12 = scmp.lt.s32.totalorder %s2460_s8, %s2460_s8 }
 0x3ef   :  { %v1398_v38 = vpack.c.bf16 %v1394_v22, %v1391_v60  ;;  %v2102_v22 = vunpack.c.l.bf16 %v2109_v48 }
 0x3f0   :  { %v1397_v8 = vpack.c.bf16 %v1386_v12, %v1383_v34  ;;  %v2098_v12 = vunpack.c.l.bf16 %v2108_v43  ;;  %p2467_p13 = por %p2466_p12, %p2465_p11 }
 0x3f2   :  { %2256 = vmatprep.mubr.bf16.mxu1 %v1397_v8  ;;  %p2468_p0 = pnand %p2467_p13, %p2461_p10 }
 0x3f3   :  { %2257 = vmatmul.mubr.bf16.vlgmr.msra.gmra.mrb[8].mxu1 %v1398_v38  ;;  %v1964_v38 = vpop.permute.xlu0 %1963 }
 0x4be   :  { %v2218_v26 = vpop.f32.mrb[4].mxu0 }
 0x4bf   :  { %v1519_v52 = vpop.f32.mrb[5].mxu0 }
 0x4c0   :  { %v2219_v62 = vpop.f32.mrb[6].mxu0 }
 0x4c1   :  { %v1522_v10 = vpop.f32.mrb[7].mxu0 }
 0x4c6   :  { %v2258_v53 = vpop.f32.mrb[8].mxu1 }
 0x4c7   :  { %v2272_v54 = vadd.f32 %v2258_v53, %v2218_v26  ;;  %v1731_v55 = vpop.f32.mrb[9].mxu1  ;;  %v1973_v26 = vmul.f32 %v2102_v22, %v1964_v38 }
 0x4c8   :  { %v2273_v23 = vadd.f32 %v1731_v55, %v1519_v52  ;;  %v2259_v50 = vpop.f32.mrb[10].mxu1  ;;  %v1971_v52 = vmul.f32 %v2098_v12, %v1954_v24 }
 0x4c9   :  { %v1759_v44 = vadd.f32 %v2272_v54, %v2055_v5  ;;  %v2274_v51 = vadd.f32 %v2259_v50, %v2219_v62  ;;  %v1734_v40 = vpop.f32.mrb[11].mxu1  ;;  %v1972_v54 = vmul.f32 %v2099_v28, %v1959_v35 }
 0x4ca   :  { %v1757_v3 = vadd.f32 %v2273_v23, %v2055_v5  ;;  %v2275_v20 = vadd.f32 %v1734_v40, %v1522_v10  ;;  %v1974_v10 = vmul.f32 %v2103_v1, %v1969_v39 }
 0x4cb   :  { %2386 = vtanh.f32 %v1759_v44  ;;  %v1760_v41 = vadd.f32 %v2274_v51, %v2055_v5 }
 0x4cc   :  { %2388 = vtanh.f32 %v1757_v3  ;;  %v1758_v56 = vadd.f32 %v2275_v20, %v2055_v5 }
 0x4cd   :  { %2390 = vtanh.f32 %v1760_v41 }
 0x4ce   :  { %2392 = vtanh.f32 %v1758_v56 }
 0x4d5   :  { %v2387_v61 = vpop.eup %2386 }
 0x4d6   :  { %v2389_v59 = vpop.eup %2388 }
 0x4d7   :  { %v2391_v13 = vpop.eup %2390 }
 0x4d8   :  { %v2393_v31 = vpop.eup %2392  ;;  %v1766_v9 = vpack.c.bf16 %v2391_v13, %v2387_v61 }
 0x4d9   :  { %v1765_v29 = vpack.c.bf16 %v2393_v31, %v2389_v59 }
 0x4db   :  { %2260 = vmatprep.subr.bf16.mxu0 %v1765_v29 }
 0x4dc   :  { %2261 = vmatpush3.bf16.msra.mxu0 %v1765_v29 }
 0x4dd   :  { %2266 = vmatprep.subr.bf16.mxu0 %v1766_v9 }
 0x4df   :  { %2263 = vmatmul.mubr.msk.bf16.vlgmr.msra.gmra.mrb[8].mxu0 %vm1776_vm8, %v1774_v33 }
 0x4e0   :  { %2267 = vmatpush3.bf16.msra.mxu0 %v1766_v9  ;;  %2268 = vmatprep.mubr.msk.bf16.mxu0 %vm1776_vm8, %v1880_v36 }
 0x4e7   :  { %2269 = vmatmul.mubr.msk.bf16.vlgmr.msra.gmra.mrb[12].mxu0 %vm1776_vm8, %v1881_v45 }
 0x5b2   :  { %v2264_v37 = vpop.f32.mrb[8].mxu0 }
 0x5b3   :  { %v1870_v63 = vadd.f32 %v2264_v37, %v1866_v27  ;;  %v1817_v57 = vpop.f32.mrb[9].mxu0 }
 0x5b4   :  { %v1868_v19 = vadd.f32 %v1864_v58, %v1817_v57  ;;  %v2265_v60 = vpop.f32.mrb[10].mxu0 }
 0x5b5   :  { %1874 = vst [vmem:[#allocation13 + $0x10] sm:$0xff] %v1870_v63  ;;  %v1871_v17 = vadd.f32 %v2265_v60, %v1867_v46  ;;  %v1820_v34 = vpop.f32.mrb[11].mxu0 }
 0x5b6   :  { %1872 = vst [vmem:[#allocation13] sm:$0xff] %v1868_v19  ;;  %v1869_v8 = vadd.f32 %v1865_v47, %v1820_v34 }
 0x5b7   :  { %1875 = vst [vmem:[#allocation13 + $0x18] sm:$0xff] %v1871_v17 }
 0x5b8   :  { %1873 = vst [vmem:[#allocation13 + $0x8] sm:$0xff] %v1869_v8 }
 0x5ba   :  { %v2270_v62 = vpop.f32.mrb[12].mxu0 }
 0x5bb   :  { %v1977_v53 = vadd.f32 %v2270_v62, %v1973_v26  ;;  %v1923_v5 = vpop.f32.mrb[13].mxu0 }
 0x5bc   :  { %v1975_v55 = vadd.f32 %v1971_v52, %v1923_v5  ;;  %v2271_v23 = vpop.f32.mrb[14].mxu0 }
 0x5bd   :  { %1982 = vst [vmem:[#allocation13 + $0x30] sm:$0xff] %v1977_v53  ;;  %v1978_v50 = vadd.f32 %v2271_v23, %v1974_v10  ;;  %v1926_v44 = vpop.f32.mrb[15].mxu0 }
 0x5be   :  { %1980 = vst [vmem:[#allocation13 + $0x20] sm:$0xff] %v1975_v55  ;;  %v1976_v51 = vadd.f32 %v1972_v54, %v1926_v44 }
 0x5bf   :  { %1983 = vst [vmem:[#allocation13 + $0x38] sm:$0xff] %v1978_v50 }
 0x5c0   :  { %1981 = vst [vmem:[#allocation13 + $0x28] sm:$0xff] %v1976_v51 }
 0x5c1   :  { %2471 = shalt.err (!%p2468_p0)
}
 0x5c2   :  { %s2472_s14 = scalar_lea.hbm %s3366_s11, 1024 }
 0x5c3   :  { %p2473_p1 = scmp.ne.s32.totalorder %s3366_s11, %s2472_s14  ;;  %p2476_p2 = scmp.lt.u32.totalorder %s2472_s14, %s3366_s11 }
 0x5c5   :  { %p2478_p3 = pnand %p2476_p2, %p2473_p1 }
 0x5c7   :  { %2481 = shalt.err (!%p2478_p3)
}
 0x5c8   :  { %1995 = dma.vmem_to_hbm [thread:$0]  %s1990_s12, 1024, %s3366_s11, [#allocation9], %s2490_s29, %s2490_s29, %s2491_s30  }
 0x5c9   :  { %2486 = dma.done.wait [#allocation9], 1024  }
 0x5ca   :  { %2487 = vsyncadd [#allocation9], 4294966272 }
 0x5cb   :  { %1999 = vsyncpa [#allocation8], 1 }
 0x5cc   :  { %2000 = vsyncpa [#allocation11], 1 }
 0x5cd   :  { %2001 = vsyncpa [#allocation9], 1 }

</bundles_post_ra>
